<compile_context>
chip_gen: v7x
topology: tpu7x:2x2x1
jax: 0.10.0
libtpu: 0.0.40
codegen_flags: <defaults>
</compile_context>

<pallas_src>
import jax
import jax.numpy as jnp
from jax import lax
from jax.experimental import pallas as pl
from jax.experimental.pallas import tpu as pltpu


# ------------------------------ compiler params -------------------------------
def _detect_vmem_limit():
    # v7x has 64 MiB physical VMEM -> keep scoped limit small; v5e/v6e have 128 MiB.
    try:
        kind = jax.devices()[0].device_kind.lower()
    except Exception:
        return 32 * 1024 * 1024
    if "v7" in kind:
        return 28 * 1024 * 1024
    if ("v5" in kind) or ("v6" in kind):
        return 64 * 1024 * 1024
    return 32 * 1024 * 1024


_VMEM_LIMIT = _detect_vmem_limit()


def _cparams(sem):
    return pltpu.CompilerParams(dimension_semantics=sem,
                                vmem_limit_bytes=_VMEM_LIMIT)


_conv_cache = {}
_pool_cache = {}
_reduce_cache = {}
_gram_cache = {}


# --------------- conv 3x3, stride 1, pad 1 (+ optional fused ReLU) ------------
# Features are carried in a "wide" form (W+2 columns per row, trailing columns
# zeroed in-kernel) so the row-flattened conv never needs an extra HBM slice.
def _conv_tile_rows(H):
    for th in (32, 24, 16, 8):          # multiple of 8 so the halo block aligns
        if th <= H and H % th == 0:
            return th
    return 0                            # fall back to a single full-image block


def _make_conv_call(N, H, W, Cin, Cout, apply_relu):
    Wp = W + 2
    HF = (H + 8) * Wp                   # input is padded with (1,7) rows, (1,1) cols
    TH = _conv_tile_rows(H) if W % 2 == 0 else 0
    M = (TH if TH else H) * Wp          # matmul M dimension (rows * padded width)

    def compute(x_flat, w_ref, b_ref, o_ref):
        # x_flat: (>= M + 2*Wp + 2, Cin) row-flattened padded slab (bf16)
        acc = jnp.zeros((M, Cout), jnp.float32)
        for k in range(9):              # 9 MXU matmuls per tile (no per-row loop)
            dy, dx = divmod(k, 3)
            off = dy * Wp + dx
            acc = acc + jnp.dot(x_flat[off:off + M, :], w_ref[k],
                                preferred_element_type=jnp.float32)
        acc = acc + b_ref[...]
        if apply_relu:
            acc = jnp.maximum(acc, 0.0)
        # zero the two wrap-around ("garbage") columns so downstream pools /
        # reductions / grams can consume the wide feature directly.
        col = lax.broadcasted_iota(jnp.int32, (M, 1), 0) % Wp
        acc = jnp.where(col < W, acc, 0.0)
        o_ref[0] = acc.astype(o_ref.dtype)

    if TH:
        def kernel(a_ref, h_ref, w_ref, b_ref, o_ref):
            # main tile rows + 8 halo rows (aligned block of the same array)
            x_flat = jnp.concatenate([a_ref[0], h_ref[0]], axis=0)
            compute(x_flat, w_ref, b_ref, o_ref)

        grid = (N, H // TH)
        in_specs = [
            pl.BlockSpec((1, M, Cin), lambda n, t: (n, t, 0)),
            pl.BlockSpec((1, 8 * Wp, Cin),
                         lambda n, t: (n, (t + 1) * (TH // 8), 0)),
            pl.BlockSpec((9, Cin, Cout), lambda n, t: (0, 0, 0)),
            pl.BlockSpec((1, Cout), lambda n, t: (0, 0)),
        ]
        out_specs = pl.BlockSpec((1, M, Cout), lambda n, t: (n, t, 0))
        sem = ("parallel", "parallel")
    else:
        def kernel(a_ref, w_ref, b_ref, o_ref):
            compute(a_ref[0], w_ref, b_ref, o_ref)

        grid = (N,)
        in_specs = [
            pl.BlockSpec((1, HF, Cin), lambda n: (n, 0, 0)),
            pl.BlockSpec((9, Cin, Cout), lambda n: (0, 0, 0)),
            pl.BlockSpec((1, Cout), lambda n: (0, 0)),
        ]
        out_specs = pl.BlockSpec((1, M, Cout), lambda n: (n, 0, 0))
        sem = ("parallel",)

    call = pl.pallas_call(
        kernel,
        out_shape=jax.ShapeDtypeStruct((N, H * Wp, Cout), jnp.bfloat16),
        grid=grid,
        in_specs=in_specs,
        out_specs=out_specs,
        compiler_params=_cparams(sem),
    )
    return call, bool(TH)


def conv3x3(feat, W_true, w9, b, apply_relu):
    # feat: (N, H, W_store, Cin) bf16 with valid data in cols [0, W_true).
    # Returns a wide (N, H, W_true+2, Cout) bf16 feature (extra cols are zero).
    N, H, W_store, Cin = feat.shape
    Cout = w9.shape[-1]
    x = feat if W_store == W_true else feat[:, :, :W_true, :]
    Wp = W_true + 2
    # TODO(synk): padding is still done HBM-side (one fused XLA copy per conv).
    xp = jnp.pad(x, ((0, 0), (1, 7), (1, 1), (0, 0)))
    xf = xp.reshape(N, (H + 8) * Wp, Cin)
    key = (N, H, W_true, Cin, Cout, bool(apply_relu))
    if key not in _conv_cache:
        _conv_cache[key] = _make_conv_call(*key)
    call, tiled = _conv_cache[key]
    out = call(xf, xf, w9, b) if tiled else call(xf, w9, b)
    return out.reshape(N, H, Wp, Cout)


# -------------------------- 2x2 max-pool (+ fused ReLU) -----------------------
def _pool_tile_rows(Ho):
    for th in (32, 28, 16, 14, 8, 7, 4, 2, 1):
        if th <= Ho and Ho % th == 0:
            return th
    return 1


def _make_pool_call(N, Ho, Wos, C, apply_relu, THo):
    def kernel(x_ref, o_ref):
        x = x_ref[0].astype(jnp.float32)        # (2*THo, Wos, 2, C)
        m = jnp.max(x, axis=2)                  # column-pair max (sublane reduce)
        m = jnp.maximum(m[0::2], m[1::2])       # row-pair max (leading-dim slices)
        if apply_relu:                          # ReLU commutes with max
            m = jnp.maximum(m, 0.0)
        o_ref[0] = m.astype(o_ref.dtype)

    return pl.pallas_call(
        kernel,
        out_shape=jax.ShapeDtypeStruct((N, Ho, Wos, C), jnp.bfloat16),
        grid=(N, Ho // THo),
        in_specs=[pl.BlockSpec((1, 2 * THo, Wos, 2, C),
                               lambda n, t: (n, t, 0, 0, 0))],
        out_specs=pl.BlockSpec((1, THo, Wos, C), lambda n, t: (n, t, 0, 0)),
        compiler_params=_cparams(("parallel", "parallel")),
    )


def maxpool2x2(feat, W_true, apply_relu=True):
    # feat: (N, H, W_store, C); valid data in cols [0, W_true).
    N, H, W_store, C = feat.shape
    Ho = H // 2
    if W_true % 2 == 0 and W_store % 2 == 0:
        cols = W_store                  # trailing zero columns simply pool to zero
    else:
        cols = 2 * (W_true // 2)
    x = feat
    if 2 * Ho != H or cols != W_store:
        x = feat[:, :2 * Ho, :cols, :]
    Wos = cols // 2
    x5 = x.reshape(N, 2 * Ho, Wos, 2, C)        # expose column pairs (free reshape)
    THo = _pool_tile_rows(Ho)
    key = (N, Ho, Wos, C, bool(apply_relu), THo)
    if key not in _pool_cache:
        _pool_cache[key] = _make_pool_call(*key)
    return _pool_cache[key](x5), W_true // 2


# -------------- mean |x-y| (L1) / mean (x-y)^2 (L2) reduction -----------------
def _pick_chunk_rows(R, lanes, itembytes, cap_bytes=1024 * 1024):
    cap = max(16, cap_bytes // max(1, lanes * itembytes))
    if R <= cap:
        return R
    for tr in range(cap, 15, -1):
        if tr % 16 == 0 and R % tr == 0:
            return tr
    return R


def _make_reduce_call(G, TR, lanes, metric):
    def kernel(x_ref, y_ref, o_ref):
        d = x_ref[...].astype(jnp.float32) - y_ref[...].astype(jnp.float32)
        v = jnp.abs(d) if metric == 'l1' else d * d
        o_ref[0] = jnp.sum(v, keepdims=True)

    return pl.pallas_call(
        kernel,
        out_shape=jax.ShapeDtypeStruct((G, 1, 1), jnp.float32),
        grid=(G,),
        in_specs=[pl.BlockSpec((TR, lanes), lambda g: (g, 0)),
                  pl.BlockSpec((TR, lanes), lambda g: (g, 0))],
        out_specs=pl.BlockSpec((1, 1, 1), lambda g: (g, 0, 0)),
        compiler_params=_cparams(("parallel",)),
    )


def mean_diff(x, y, metric, denom):
    # sum(|x-y|) or sum((x-y)^2) / denom; zeroed "wide" columns contribute 0,
    # so `denom` carries the true element count.
    E = x.size
    lanes = 128 if E % 128 == 0 else x.shape[-1]
    R = E // lanes
    x2 = x.reshape(R, lanes)
    y2 = y.reshape(R, lanes)
    TR = _pick_chunk_rows(R, lanes, x.dtype.itemsize)
    G = R // TR
    key = (G, TR, lanes, metric)
    if key not in _reduce_cache:
        _reduce_cache[key] = _make_reduce_call(*key)
    parts = _reduce_cache[key](x2, y2)
    return jnp.sum(parts) / denom


# -------------------------------- Gram matrices -------------------------------
def _make_gram_call(N, S, C, TS):
    def kernel(a_ref, o_ref):
        @pl.when(pl.program_id(1) == 0)
        def _init():
            o_ref[...] = jnp.zeros_like(o_ref)

        a = a_ref[0]                                          # (TS, C) bf16
        o_ref[0] += lax.dot_general(a, a, (((0,), (0,)), ((), ())),
                                    preferred_element_type=jnp.float32)

    return pl.pallas_call(
        kernel,
        out_shape=jax.ShapeDtypeStruct((N, C, C), jnp.float32),
        grid=(N, S // TS),
        in_specs=[pl.BlockSpec((1, TS, C), lambda n, s: (n, s, 0))],
        out_specs=pl.BlockSpec((1, C, C), lambda n, s: (n, 0, 0)),
        compiler_params=_cparams(("parallel", "arbitrary")),
    )


def gram_matrix(feat, W_true, normalize):
    # Transpose-free gram: contract over the flattened spatial axis (zero wide
    # columns contribute nothing).
    N, H, W_store, C = feat.shape
    S = H * W_store
    act = feat.reshape(N, S, C)
    TS = _pick_chunk_rows(S, C, feat.dtype.itemsize)
    key = (N, S, C, TS)
    if key not in _gram_cache:
        _gram_cache[key] = _make_gram_call(*key)
    g = _gram_cache[key](act)
    if normalize:
        g = g / (C * H * W_true)
    return g


# -------------------- VGG16 features (before_relu=True blocks) ----------------
_VGG_CONV_CFG = [(3, 64), (64, 64),
                 (64, 128), (128, 128),
                 (128, 256), (256, 256), (256, 256),
                 (256, 512), (512, 512), (512, 512),
                 (512, 512), (512, 512), (512, 512)]
_BLOCK_NUM_CONVS = [2, 2, 3, 3, 3]


def init_vgg16_params(key):
    # TODO(synk): deterministic synthetic He-init weights; pretrained torchvision
    # VGG16 weights cannot be loaded in a self-contained, no-IO script.
    params = []
    for cin, cout in _VGG_CONV_CFG:
        key, kw = jax.random.split(key)
        w = jax.random.normal(kw, (3, 3, cin, cout), jnp.float32)
        w = w * (2.0 / (9.0 * cin)) ** 0.5
        params.append((w, jnp.zeros((cout,), jnp.float32)))
    return params


def _prep_params(params):
    prepped = []
    for w, b in params:
        cin, cout = w.shape[2], w.shape[3]
        w9 = jnp.asarray(w, jnp.float32).reshape(9, cin, cout).astype(jnp.bfloat16)
        prepped.append((w9, jnp.asarray(b, jnp.float32).reshape(1, cout)))
    return prepped


def vgg_features(x, params9):
    # before_relu=True: each checkpoint is the last conv output of the block
    # (pre-ReLU); the leading ReLU + MaxPool of the next block are fused into
    # the pooling kernel.
    feats = []
    ci = 0
    W_true = x.shape[2]
    cur = x
    for bi, nconv in enumerate(_BLOCK_NUM_CONVS):
        if bi > 0:
            cur, W_true = maxpool2x2(cur, W_true, apply_relu=True)
        for j in range(nconv):
            w9, b = params9[ci]
            ci += 1
            cur = conv3x3(cur, W_true, w9, b, apply_relu=(j != nconv - 1))
        feats.append((cur, W_true))
    return feats


# --------------------------------- forward pass -------------------------------
_IMNET_MEAN = jnp.array([0.485, 0.456, 0.406], jnp.float32).reshape(1, 3, 1, 1)
_IMNET_STD = jnp.array([0.229, 0.224, 0.225], jnp.float32).reshape(1, 3, 1, 1)


def vgg_perceptual_loss(params, inp, tgt,
                        feature_layers=(0, 1, 2, 3), style_layers=(),
                        wstyle_layers=(), style_coe=1.0,
                        style_normalize=True, style_metric='l2',
                        resize=True):
    # inp / tgt: NCHW float32 (PyTorch layout)
    assert style_metric in ('l1', 'l2'), "metric should be either 'l1' or 'l2'."
    if inp.shape[1] != 3:
        inp = jnp.tile(inp, (1, 3, 1, 1))
        tgt = jnp.tile(tgt, (1, 3, 1, 1))
    inp = (inp - _IMNET_MEAN) / _IMNET_STD
    tgt = (tgt - _IMNET_MEAN) / _IMNET_STD
    inp = jnp.transpose(inp, (0, 2, 3, 1))      # NCHW -> NHWC for the kernels
    tgt = jnp.transpose(tgt, (0, 2, 3, 1))
    if resize:
        # bilinear, half-pixel centers == torch align_corners=False (JAX glue)
        n = inp.shape[0]
        inp = jax.image.resize(inp, (n, 224, 224, 3), method='bilinear')
        tgt = jax.image.resize(tgt, (n, 224, 224, 3), method='bilinear')
    inp = inp.astype(jnp.bfloat16)
    tgt = tgt.astype(jnp.bfloat16)

    params9 = _prep_params(params)
    style_layers = list(style_layers)
    wstyle = list(wstyle_layers) if wstyle_layers else [1.0] * len(style_layers)

    fx = vgg_features(inp, params9)
    fy = vgg_features(tgt, params9)

    feature_loss = jnp.float32(0.0)
    style_loss = jnp.float32(0.0)
    for i in range(len(fx)):
        xi, wt = fx[i]
        yi, _ = fy[i]
        N, H, _, C = xi.shape
        if i in feature_layers:
            feature_loss = feature_loss + mean_diff(xi, yi, 'l1',
                                                    denom=N * H * wt * C)
        if i in style_layers:
            gx = gram_matrix(xi, wt, style_normalize)
            gy = gram_matrix(yi, wt, style_normalize)
            style_loss = style_loss + (mean_diff(gx, gy, style_metric,
                                                 denom=gx.size)
                                       * wstyle[style_layers.index(i)])
    return feature_loss + style_coe * style_loss


if __name__ == "__main__":
    key = jax.random.PRNGKey(0)
    kp, k1, k2 = jax.random.split(key, 3)
    params = init_vgg16_params(kp)

    # single-channel inputs exercise the channel-repeat branch (C != 3)
    inp = jax.random.uniform(k1, (2, 1, 16, 16), jnp.float32)
    tgt = jax.random.uniform(k2, (2, 1, 16, 16), jnp.float32)

    # default forward (feature_layers=[0,1,2,3], no style); resize=False keeps
    # the demo small -- the resize=True path is plain-JAX glue.
    loss = vgg_perceptual_loss(params, inp, tgt, resize=False)
    loss = jax.block_until_ready(loss)

    # also exercise the style / Gram-matrix kernels
    loss2 = vgg_perceptual_loss(params, inp, tgt, resize=False,
                                feature_layers=(0, 1, 2, 3),
                                style_layers=(2, 3), style_metric='l2')
    loss2 = jax.block_until_ready(loss2)

    assert bool(jnp.isfinite(loss)) and bool(jnp.isfinite(loss2))
    print("KERNEL_OK")
</pallas_src>

<mosaic_0001>
module attributes {stable_mosaic.version = 11 : i64} {
  func.func @kernel(%arg0: i32, %arg1: i32, %arg2: memref<1x288x3xbf16, #tpu.memory_space<vmem>>, %arg3: memref<1x144x3xbf16, #tpu.memory_space<vmem>>, %arg4: memref<9x3x64xbf16, #tpu.memory_space<vmem>>, %arg5: memref<1x64xf32, #tpu.memory_space<vmem>>, %arg6: memref<1x288x64xbf16, #tpu.memory_space<vmem>>) attributes {dimension_semantics = [#tpu.dimension_semantics<parallel>, #tpu.dimension_semantics<parallel>], iteration_bounds = array<i64: 2, 1>, scalar_prefetch = 0 : i64, scratch_operands = 0 : i64, tpu.core_type = #tpu.core_type<tc>, window_params = [{transform_indices = @transform_0, window_bounds = array<i64: 1, 288, 3>}, {transform_indices = @transform_1, window_bounds = array<i64: 1, 144, 3>}, {pipeline_mode = #tpu.pipeline_mode<synchronous>, transform_indices = @transform_2, window_bounds = array<i64: 9, 3, 64>}, {pipeline_mode = #tpu.pipeline_mode<synchronous>, transform_indices = @transform_3, window_bounds = array<i64: 1, 64>}, {transform_indices = @transform_4, window_bounds = array<i64: 1, 288, 64>}]} {
    %c0 = arith.constant 0 : index
    %c0_0 = arith.constant 0 : index
    %c0_1 = arith.constant 0 : index
    %0 = vector.load %arg2[%c0, %c0_0, %c0_1] : memref<1x288x3xbf16, #tpu.memory_space<vmem>>, vector<1x288x3xbf16>
    %1 = vector.shape_cast %0 : vector<1x288x3xbf16> to vector<288x3xbf16>
    %c0_2 = arith.constant 0 : index
    %c0_3 = arith.constant 0 : index
    %c0_4 = arith.constant 0 : index
    %2 = vector.load %arg3[%c0_2, %c0_3, %c0_4] : memref<1x144x3xbf16, #tpu.memory_space<vmem>>, vector<1x144x3xbf16>
    %3 = vector.shape_cast %2 : vector<1x144x3xbf16> to vector<144x3xbf16>
    %4 = tpu.concatenate %1, %3 in 0 : vector<288x3xbf16>, vector<144x3xbf16> -> vector<432x3xbf16>
    %cst = arith.constant 0.000000e+00 : f32
    %5 = vector.broadcast %cst : f32 to vector<288x64xf32>
    %6 = vector.extract_strided_slice %4 {offsets = [0, 0], sizes = [288, 3], strides = [1, 1]} : vector<432x3xbf16> to vector<288x3xbf16>
    %c0_5 = arith.constant 0 : index
    %c0_6 = arith.constant 0 : index
    %c0_7 = arith.constant 0 : index
    %7 = vector.load %arg4[%c0_5, %c0_6, %c0_7] : memref<9x3x64xbf16, #tpu.memory_space<vmem>>, vector<1x3x64xbf16>
    %8 = vector.shape_cast %7 : vector<1x3x64xbf16> to vector<3x64xbf16>
    %cst_8 = arith.constant dense<0.000000e+00> : vector<288x64xf32>
    %9 = tpu.matmul %6, %8, %cst_8 {dimension_numbers = #tpu.dot_dimension_numbers<[1], [0], [0], [1], [0, 0, 1, 1], [], []>} : vector<288x3xbf16>, vector<3x64xbf16>, vector<288x64xf32> -> vector<288x64xf32>
    %10 = arith.addf %5, %9 : vector<288x64xf32>
    %11 = vector.extract_strided_slice %4 {offsets = [1, 0], sizes = [288, 3], strides = [1, 1]} : vector<432x3xbf16> to vector<288x3xbf16>
    %c1 = arith.constant 1 : index
    %c0_9 = arith.constant 0 : index
    %c0_10 = arith.constant 0 : index
    %12 = vector.load %arg4[%c1, %c0_9, %c0_10] : memref<9x3x64xbf16, #tpu.memory_space<vmem>>, vector<1x3x64xbf16>
    %13 = vector.shape_cast %12 : vector<1x3x64xbf16> to vector<3x64xbf16>
    %cst_11 = arith.constant dense<0.000000e+00> : vector<288x64xf32>
    %14 = tpu.matmul %11, %13, %cst_11 {dimension_numbers = #tpu.dot_dimension_numbers<[1], [0], [0], [1], [0, 0, 1, 1], [], []>} : vector<288x3xbf16>, vector<3x64xbf16>, vector<288x64xf32> -> vector<288x64xf32>
    %15 = arith.addf %10, %14 : vector<288x64xf32>
    %16 = vector.extract_strided_slice %4 {offsets = [2, 0], sizes = [288, 3], strides = [1, 1]} : vector<432x3xbf16> to vector<288x3xbf16>
    %c2 = arith.constant 2 : index
    %c0_12 = arith.constant 0 : index
    %c0_13 = arith.constant 0 : index
    %17 = vector.load %arg4[%c2, %c0_12, %c0_13] : memref<9x3x64xbf16, #tpu.memory_space<vmem>>, vector<1x3x64xbf16>
    %18 = vector.shape_cast %17 : vector<1x3x64xbf16> to vector<3x64xbf16>
    %cst_14 = arith.constant dense<0.000000e+00> : vector<288x64xf32>
    %19 = tpu.matmul %16, %18, %cst_14 {dimension_numbers = #tpu.dot_dimension_numbers<[1], [0], [0], [1], [0, 0, 1, 1], [], []>} : vector<288x3xbf16>, vector<3x64xbf16>, vector<288x64xf32> -> vector<288x64xf32>
    %20 = arith.addf %15, %19 : vector<288x64xf32>
    %21 = vector.extract_strided_slice %4 {offsets = [18, 0], sizes = [288, 3], strides = [1, 1]} : vector<432x3xbf16> to vector<288x3xbf16>
    %c3 = arith.constant 3 : index
    %c0_15 = arith.constant 0 : index
    %c0_16 = arith.constant 0 : index
    %22 = vector.load %arg4[%c3, %c0_15, %c0_16] : memref<9x3x64xbf16, #tpu.memory_space<vmem>>, vector<1x3x64xbf16>
    %23 = vector.shape_cast %22 : vector<1x3x64xbf16> to vector<3x64xbf16>
    %cst_17 = arith.constant dense<0.000000e+00> : vector<288x64xf32>
    %24 = tpu.matmul %21, %23, %cst_17 {dimension_numbers = #tpu.dot_dimension_numbers<[1], [0], [0], [1], [0, 0, 1, 1], [], []>} : vector<288x3xbf16>, vector<3x64xbf16>, vector<288x64xf32> -> vector<288x64xf32>
    %25 = arith.addf %20, %24 : vector<288x64xf32>
    %26 = vector.extract_strided_slice %4 {offsets = [19, 0], sizes = [288, 3], strides = [1, 1]} : vector<432x3xbf16> to vector<288x3xbf16>
    %c4 = arith.constant 4 : index
    %c0_18 = arith.constant 0 : index
    %c0_19 = arith.constant 0 : index
    %27 = vector.load %arg4[%c4, %c0_18, %c0_19] : memref<9x3x64xbf16, #tpu.memory_space<vmem>>, vector<1x3x64xbf16>
    %28 = vector.shape_cast %27 : vector<1x3x64xbf16> to vector<3x64xbf16>
    %cst_20 = arith.constant dense<0.000000e+00> : vector<288x64xf32>
    %29 = tpu.matmul %26, %28, %cst_20 {dimension_numbers = #tpu.dot_dimension_numbers<[1], [0], [0], [1], [0, 0, 1, 1], [], []>} : vector<288x3xbf16>, vector<3x64xbf16>, vector<288x64xf32> -> vector<288x64xf32>
    %30 = arith.addf %25, %29 : vector<288x64xf32>
    %31 = vector.extract_strided_slice %4 {offsets = [20, 0], sizes = [288, 3], strides = [1, 1]} : vector<432x3xbf16> to vector<288x3xbf16>
    %c5 = arith.constant 5 : index
    %c0_21 = arith.constant 0 : index
    %c0_22 = arith.constant 0 : index
    %32 = vector.load %arg4[%c5, %c0_21, %c0_22] : memref<9x3x64xbf16, #tpu.memory_space<vmem>>, vector<1x3x64xbf16>
    %33 = vector.shape_cast %32 : vector<1x3x64xbf16> to vector<3x64xbf16>
    %cst_23 = arith.constant dense<0.000000e+00> : vector<288x64xf32>
    %34 = tpu.matmul %31, %33, %cst_23 {dimension_numbers = #tpu.dot_dimension_numbers<[1], [0], [0], [1], [0, 0, 1, 1], [], []>} : vector<288x3xbf16>, vector<3x64xbf16>, vector<288x64xf32> -> vector<288x64xf32>
    %35 = arith.addf %30, %34 : vector<288x64xf32>
    %36 = vector.extract_strided_slice %4 {offsets = [36, 0], sizes = [288, 3], strides = [1, 1]} : vector<432x3xbf16> to vector<288x3xbf16>
    %c6 = arith.constant 6 : index
    %c0_24 = arith.constant 0 : index
    %c0_25 = arith.constant 0 : index
    %37 = vector.load %arg4[%c6, %c0_24, %c0_25] : memref<9x3x64xbf16, #tpu.memory_space<vmem>>, vector<1x3x64xbf16>
    %38 = vector.shape_cast %37 : vector<1x3x64xbf16> to vector<3x64xbf16>
    %cst_26 = arith.constant dense<0.000000e+00> : vector<288x64xf32>
    %39 = tpu.matmul %36, %38, %cst_26 {dimension_numbers = #tpu.dot_dimension_numbers<[1], [0], [0], [1], [0, 0, 1, 1], [], []>} : vector<288x3xbf16>, vector<3x64xbf16>, vector<288x64xf32> -> vector<288x64xf32>
    %40 = arith.addf %35, %39 : vector<288x64xf32>
    %41 = vector.extract_strided_slice %4 {offsets = [37, 0], sizes = [288, 3], strides = [1, 1]} : vector<432x3xbf16> to vector<288x3xbf16>
    %c7 = arith.constant 7 : index
    %c0_27 = arith.constant 0 : index
    %c0_28 = arith.constant 0 : index
    %42 = vector.load %arg4[%c7, %c0_27, %c0_28] : memref<9x3x64xbf16, #tpu.memory_space<vmem>>, vector<1x3x64xbf16>
    %43 = vector.shape_cast %42 : vector<1x3x64xbf16> to vector<3x64xbf16>
    %cst_29 = arith.constant dense<0.000000e+00> : vector<288x64xf32>
    %44 = tpu.matmul %41, %43, %cst_29 {dimension_numbers = #tpu.dot_dimension_numbers<[1], [0], [0], [1], [0, 0, 1, 1], [], []>} : vector<288x3xbf16>, vector<3x64xbf16>, vector<288x64xf32> -> vector<288x64xf32>
    %45 = arith.addf %40, %44 : vector<288x64xf32>
    %46 = vector.extract_strided_slice %4 {offsets = [38, 0], sizes = [288, 3], strides = [1, 1]} : vector<432x3xbf16> to vector<288x3xbf16>
    %c8 = arith.constant 8 : index
    %c0_30 = arith.constant 0 : index
    %c0_31 = arith.constant 0 : index
    %47 = vector.load %arg4[%c8, %c0_30, %c0_31] : memref<9x3x64xbf16, #tpu.memory_space<vmem>>, vector<1x3x64xbf16>
    %48 = vector.shape_cast %47 : vector<1x3x64xbf16> to vector<3x64xbf16>
    %cst_32 = arith.constant dense<0.000000e+00> : vector<288x64xf32>
    %49 = tpu.matmul %46, %48, %cst_32 {dimension_numbers = #tpu.dot_dimension_numbers<[1], [0], [0], [1], [0, 0, 1, 1], [], []>} : vector<288x3xbf16>, vector<3x64xbf16>, vector<288x64xf32> -> vector<288x64xf32>
    %50 = arith.addf %45, %49 : vector<288x64xf32>
    %c0_33 = arith.constant 0 : index
    %c0_34 = arith.constant 0 : index
    %51 = vector.load %arg5[%c0_33, %c0_34] : memref<1x64xf32, #tpu.memory_space<vmem>>, vector<1x64xf32>
    %52 = vector.broadcast %51 : vector<1x64xf32> to vector<288x64xf32>
    %53 = arith.addf %50, %52 : vector<288x64xf32>
    %cst_35 = arith.constant 0.000000e+00 : f32
    %54 = vector.broadcast %cst_35 : f32 to vector<288x64xf32>
    %55 = arith.maximumf %53, %54 : vector<288x64xf32>
    %56 = tpu.iota {dimensions = array<i32: 0>} : vector<288x1xi32>
    %c18_i32 = arith.constant 18 : i32
    %c0_i32 = arith.constant 0 : i32
    %57 = arith.cmpi eq, %c18_i32, %c0_i32 : i32
    %c1_i32 = arith.constant 1 : i32
    %58 = arith.select %57, %c1_i32, %c18_i32 : i32
    %59 = vector.broadcast %58 : i32 to vector<288x1xi32>
    %60 = arith.remsi %56, %59 : vector<288x1xi32>
    %c0_i32_36 = arith.constant 0 : i32
    %61 = vector.broadcast %c0_i32_36 : i32 to vector<288x1xi32>
    %62 = arith.cmpi ne, %60, %61 : vector<288x1xi32>
    %c0_i32_37 = arith.constant 0 : i32
    %63 = vector.broadcast %c0_i32_37 : i32 to vector<288x1xi32>
    %64 = arith.cmpi slt, %60, %63 : vector<288x1xi32>
    %c0_i32_38 = arith.constant 0 : i32
    %65 = arith.cmpi slt, %58, %c0_i32_38 : i32
    %66 = vector.broadcast %65 : i1 to vector<288x1xi1>
    %67 = vector.broadcast %66 : vector<288x1xi1> to vector<288x1xi1>
    %68 = arith.xori %64, %67 : vector<288x1xi1>
    %69 = arith.andi %68, %62 : vector<288x1xi1>
    %70 = vector.broadcast %58 : i32 to vector<288x1xi32>
    %71 = arith.addi %60, %70 : vector<288x1xi32>
    %72 = arith.select %69, %71, %60 : vector<288x1xi1>, vector<288x1xi32>
    %c16_i32 = arith.constant 16 : i32
    %73 = vector.broadcast %c16_i32 : i32 to vector<288x1xi32>
    %74 = arith.cmpi slt, %72, %73 : vector<288x1xi32>
    %cst_39 = arith.constant 0.000000e+00 : f32
    %75 = vector.shape_cast %74 : vector<288x1xi1> to vector<288x1xi1>
    %76 = vector.broadcast %75 : vector<288x1xi1> to vector<288x64xi1>
    %77 = vector.broadcast %cst_39 : f32 to vector<288x64xf32>
    %78 = arith.select %76, %55, %77 : vector<288x64xi1>, vector<288x64xf32>
    %79 = arith.truncf %78 : vector<288x64xf32> to vector<288x64xbf16>
    %c0_40 = arith.constant 0 : index
    %c0_41 = arith.constant 0 : index
    %c0_42 = arith.constant 0 : index
    %80 = vector.load %arg6[%c0_40, %c0_41, %c0_42] : memref<1x288x64xbf16, #tpu.memory_space<vmem>>, vector<1x288x64xbf16>
    %81 = vector.shape_cast %80 : vector<1x288x64xbf16> to vector<288x64xbf16>
    %82 = vector.shape_cast %79 : vector<288x64xbf16> to vector<1x288x64xbf16>
    tpu.vector_store %arg6[%c0_40, %c0_41, %c0_42], %82 {strides = array<i32>} : memref<1x288x64xbf16, #tpu.memory_space<vmem>>, vector<1x288x64xbf16>,
    return
  }
  func.func @transform_0(%arg0: i32, %arg1: i32) -> (i32, i32, i32) {
    %c0_i32 = arith.constant 0 : i32
    %c0_i32_0 = arith.constant 0 : i32
    return %arg0, %arg1, %c0_i32 : i32, i32, i32
  }
  func.func @transform_1(%arg0: i32, %arg1: i32) -> (i32, i32, i32) {
    %c1_i32 = arith.constant 1 : i32
    %0 = arith.addi %arg1, %c1_i32 : i32
    %c2_i32 = arith.constant 2 : i32
    %1 = arith.muli %0, %c2_i32 : i32
    %c0_i32 = arith.constant 0 : i32
    %c0_i32_0 = arith.constant 0 : i32
    return %arg0, %1, %c0_i32 : i32, i32, i32
  }
  func.func @transform_2(%arg0: i32, %arg1: i32) -> (i32, i32, i32) {
    %c0_i32 = arith.constant 0 : i32
    %c0_i32_0 = arith.constant 0 : i32
    %c0_i32_1 = arith.constant 0 : i32
    %c0_i32_2 = arith.constant 0 : i32
    return %c0_i32, %c0_i32_0, %c0_i32_1 : i32, i32, i32
  }
  func.func @transform_3(%arg0: i32, %arg1: i32) -> (i32, i32) {
    %c0_i32 = arith.constant 0 : i32
    %c0_i32_0 = arith.constant 0 : i32
    %c0_i32_1 = arith.constant 0 : i32
    return %c0_i32, %c0_i32_0 : i32, i32
  }
  func.func @transform_4(%arg0: i32, %arg1: i32) -> (i32, i32, i32) {
    %c0_i32 = arith.constant 0 : i32
    %c0_i32_0 = arith.constant 0 : i32
    return %arg0, %arg1, %c0_i32 : i32, i32, i32
  }
}

</mosaic_0001>

<bundles_post_ra>
// kernel: tpu_custom_call.1
= control target key start
LH: loop header
LB: loop body
LE: loop exit
PB: predicated region body
PF: predicated region fallthrough
CT: control target
= control target key end

     0   :  { %s5519_s15 = smov 0   ;;  %s5521_s16 = smov 0   ;;  %s7954_s0 = inlined_call_operand.vmem [shape: bf16[2,432,3], index: 0, kind: input, shape index: {}]   ;;  %s7955_s1 = inlined_call_operand.vmem [shape: bf16[2,432,3], index: 1, kind: input, shape index: {}]   ;;  %s7956_s2 = inlined_call_operand.vmem [shape: bf16[9,3,64], index: 2, kind: input, shape index: {}]   ;;  %s7957_s3 = inlined_call_operand.vmem [shape: f32[1,64], index: 3, kind: input, shape index: {}]   ;;  %s7958_s4 = inlined_call_operand.vmem [shape: bf16[2,288,64], index: 4, kind: output, shape index: {}]  }
   0x1   :  { %s5523_s17 = smov 0  }
   0x2 LB: > { %s26_s18 = sadd.s32 1, %s5487_s16  ;;  %p4272_p0 = scmp.ge.s32.totalorder %s5491_s17, 1  ;;  %s5491_s17 = sphi %s5523_s17, %s14_s17   ;;  %s5487_s16 = sphi %s5521_s16, %s8391_s16   ;;  %s5483_s15 = sphi %s5519_s15, %s8390_s15  }
   0x3   : > { %p28_p1 = scmp.ge.s32.totalorder %s26_s18, 2  ;;  %p216_p2 = scmp.lt.s32.totalorder %s5491_s17, 3 }
   0x5   : > { %s8393_s18 = smov (%p28_p1, %s26_s18), 0  ;;  %p217_p3 = pnand %p4272_p0, %p216_p2 }
   0x7   : > { %220 = sbr.rel (%p217_p3) target bundleno = 594 (0x252), region = 36 }
   0xe   : > { %vm662_vm0 = vcmask 1040384   ;;  %vm663_vm1 = vcmask 1041408   ;;  %v4372_v0 = vld [vmem:[%s7956_s2 + $0x8] sm:$0x3]  ;;  %p270_p4 = scmp.lt.s32.totalorder %s5483_s15, 1  ;;  %v5493_v1 = vmov 65535  }
   0xf   : > { %v664_v2 = vsel %vm662_vm0, 4294967295, %v5493_v1  ;;  %v4297_v3 = vld [vmem:[%s7956_s2 + $0x2] sm:$0x3]  ;;  %v4391_v5 = vld [vmem:[%s7956_s2 + $0xa] sm:$0x3]  ;;  %vm607_vm4 = vcmask 23552  }
  0x10   : > { %v5543_v4 = vsel %vm663_vm1, %v664_v2, 0  ;;  %s8395_s15 = smov (!%p270_p4, %s5483_s15), 1  ;;  %v455_v9 = vld [vmem:[%s7956_s2] sm:$0x3]  ;;  %vm458_vm2 = vsmask.f32 7424 }
  0x11   : > { %v5551_v6 = vand.u32 %v4372_v0, %v5543_v4  ;;  %v667_v7 = vand.u32 %v4297_v3, %v5543_v4  ;;  %v5555_v8 = vand.u32 %v4391_v5, %v5543_v4  ;;  %s5347_s27 = smul.u32 216, %s8395_s15  ;;  %v883_v10 = vand.u32 %v5543_v4, %v455_v9  ;;  %v4410_v11 = vld [vmem:[%s7956_s2 + $0xc] sm:$0x3]  ;;  %v4334_v12 = vld [vmem:[%s7956_s2 + $0x4] sm:$0x3] }
  0x12   : > { %vm1597_vm3 = vsmask.f32 6400  ;;  %v5604_v24 = vand.u32 %v4410_v11, %v5543_v4  ;;  %v5607_v25 = vand.u32 %v4334_v12, %v5543_v4  ;;  %vm1952_vm5 = vcmask 1045504   ;;  %s5349_s25 = smul.u32 144, %s8395_s15 }
  0x13   : > { %4867 = vmatprep.subr.bf16.mxu0 %v5551_v6  ;;  %4715 = vmatprep.subr.bf16.mxu1 %v667_v7  ;;  %s5569_s30 = scalar_lea.vmem %s7954_s0, %s5347_s27  ;;  %s4507_s9 = sadd.s32 144, %s5347_s27  ;;  %vm2485_vm6 = vsmask.f32 5376  ;;  %vm1064_vm7 = vcmask 1046528   ;;  %vm2838_vm8 = vcmask 1044480  }
  0x14   : > { %4868 = vmatpush3.bf16.msra.mxu0 %v5551_v6  ;;  %4716 = vmatpush3.bf16.msra.mxu1 %v667_v7  ;;  %v5579_v13 = vld [vmem:[%s5569_s30] sm:$0xff]   ;;  %v5582_v14 = vld [vmem:[%s5569_s30 + $0x8] sm:$0xff]   ;;  %v5585_v15 = vld [vmem:[%s5569_s30 + $0x10] sm:$0xff]   ;;  %s5722_s12 = scalar_lea.vmem %s7955_s1, %s4507_s9  ;;  %s7261_s27 = scalar_lea.vmem %s7958_s4, %s5349_s25 }
  0x15   : > { %4905 = vmatprep.subr.bf16.mxu0 %v5555_v8  ;;  %4753 = vmatprep.subr.bf16.mxu1 %v883_v10  ;;  %v460_v16 = vshrl.u32 %v5579_v13, 16  ;;  %v462_v17 = vshll.u32 %v5579_v13, 16  ;;  %v467_v18 = vshll.u32 %v5582_v14, 16  ;;  %v471_v19 = vshrl.u32 %v5582_v14, 16  ;;  %v5598_v22 = vld [vmem:[%s5569_s30 + $0x18] sm:$0xff]   ;;  %v5601_v23 = vld [vmem:[%s5569_s30 + $0x20] sm:$0xff]  }
  0x16   : > { %v5592_v20 = vshll.u32 %v5585_v15, 16  ;;  %v5595_v21 = vshrl.u32 %v5585_v15, 16  ;;  %v5613_v33 = vshll.u32 %v5598_v22, 16  ;;  %v5616_v37 = vshrl.u32 %v5598_v22, 16  ;;  %v5619_v38 = vld [vmem:[%s5569_s30 + $0x28] sm:$0xff]   ;;  %v5631_v47 = vld [vmem:[%s5569_s30 + $0x30] sm:$0xff]  }
  0x17   : > { %v464_v26 = vrot.slane %v462_v17, 1  ;;  %v469_v27 = vrot.slane %v467_v18, 1  ;;  %v1598_v28 = vrot.slane %v471_v19, 1  ;;  %v1599_v29 = vrot.slane %v467_v18, 2  ;;  %v5648_v56 = vld [vmem:[%s5569_s30 + $0x38] sm:$0xff]   ;;  %v5670_v5 = vld [vmem:[%s5569_s30 + $0x40] sm:$0xff]  }
  0x18   : > { %v1601_v30 = vrot.slane %v5595_v21, 1  ;;  %v1602_v31 = vrot.slane %v5592_v20, 2  ;;  %v477_v32 = vrot.slane %v5592_v20, 1  ;;  %v1606_v40 = vrot.slane %v5613_v33, 2 }
  0x19   : > { %v465_v34 = vor.u32 %v464_v26, %v460_v16  ;;  %v473_v35 = vor.u32 %v471_v19, %v469_v27  ;;  %v1600_v36 = vor.u32 %v1599_v29, %v1598_v28  ;;  %v485_v42 = vrot.slane %v5613_v33, 1 }
  0x1a   : > { %v1603_v39 = vor.u32 %v1602_v31, %v1601_v30  ;;  %v481_v41 = vor.u32 %v5595_v21, %v477_v32  ;;  %v1605_v45 = vrot.slane %v5616_v37, 1  ;;  %v5628_v46 = vshll.u32 %v5601_v23, 16  ;;  %v5699_v30 = vld [vmem:[%s5569_s30 + $0x48] sm:$0xff]  }
  0x1b   : > { %v470_v43 = vsel %vm458_vm2, %v465_v34, %v469_v27  ;;  %v478_v44 = vsel %vm458_vm2, %v473_v35, %v477_v32  ;;  %v5637_v50 = vshrl.u32 %v5601_v23, 16  ;;  %v489_v51 = vor.u32 %v5616_v37, %v485_v42  ;;  %v5706_v35 = vld [vmem:[%s5569_s30 + $0x50] sm:$0xff]  }
  0x1c   : > { %4717 = vmatprep.mubr.msk.bf16.mxu1 %vm607_vm4, %v470_v43  ;;  %v1604_v48 = vsel %vm1597_vm3, %v1600_v36, %v1603_v39  ;;  %v486_v49 = vsel %vm458_vm2, %v481_v41, %v485_v42  ;;  %v1607_v52 = vor.u32 %v1606_v40, %v1605_v45  ;;  %v1610_v53 = vrot.slane %v5628_v46, 2 }
  0x1d   : > { %4869 = vmatprep.mubr.msk.bf16.mxu0 %vm607_vm4, %v1604_v48  ;;  %4718 = vmatmul.mubr.msk.bf16.vlgmr.msra.gmra.mrb[0].mxu1 %vm607_vm4, %v478_v44  ;;  %v493_v54 = vrot.slane %v5628_v46, 1  ;;  %v5645_v55 = vshll.u32 %v5619_v38, 16  ;;  %v1609_v57 = vrot.slane %v5637_v50, 1  ;;  %v5653_v58 = vshrl.u32 %v5619_v38, 16 }
  0x1e   : > { %4721 = vmatprep.mubr.msk.bf16.mxu1 %vm607_vm4, %v486_v49  ;;  %4754 = vmatpush3.bf16.msra.mxu1 %v883_v10  ;;  %v5656_v59 = vshll.u32 %v5631_v47, 16  ;;  %v5659_v60 = vshrl.u32 %v5631_v47, 16  ;;  %v1608_v61 = vsel %vm1597_vm3, %v1603_v39, %v1607_v52  ;;  %v5675_v9 = vshll.u32 %v5648_v56, 16 }
  0x1f   : > { %v1614_v62 = vrot.slane %v5645_v55, 2  ;;  %v497_v63 = vor.u32 %v5637_v50, %v493_v54  ;;  %4791 = vmatprep.subr.bf16.mxu1 %v5607_v25  ;;  %4870 = vmatmul.mubr.msk.bf16.vlgmr.msra.gmra.mrb[0].mxu0 %vm607_vm4, %v1608_v61  ;;  %v1611_v0 = vor.u32 %v1610_v53, %v1609_v57  ;;  %v1613_v1 = vrot.slane %v5653_v58, 1  ;;  %v5738_v61 = vld [vmem:[%s5569_s30 + $0x58] sm:$0xff]  }
  0x20   : > { %v501_v2 = vrot.slane %v5645_v55, 1  ;;  %v1617_v3 = vrot.slane %v5659_v60, 1  ;;  %4906 = vmatpush3.bf16.msra.mxu0 %v5555_v8  ;;  %v1618_v7 = vrot.slane %v5656_v59, 2  ;;  %v5678_v10 = vshrl.u32 %v5648_v56, 16 }
  0x21   : > { %v1612_v11 = vsel %vm1597_vm3, %v1607_v52, %v1611_v0  ;;  %v494_v12 = vsel %vm458_vm2, %v489_v51, %v493_v54  ;;  %v1615_v16 = vor.u32 %v1614_v62, %v1613_v1  ;;  %4943 = vmatprep.subr.bf16.mxu0 %v5604_v24  ;;  %v509_v18 = vrot.slane %v5656_v59, 1 }
  0x22   : > { %4873 = vmatprep.mubr.msk.bf16.mxu0 %vm607_vm4, %v1612_v11  ;;  %v502_v8 = vsel %vm458_vm2, %v497_v63, %v501_v2  ;;  %v1619_v17 = vor.u32 %v1618_v7, %v1617_v3  ;;  %v5689_v19 = vshll.u32 %v5670_v5, 16  ;;  %v1621_v27 = vrot.slane %v5678_v10, 1 }
  0x23   : > { %v1616_v26 = vsel %vm1597_vm3, %v1611_v0, %v1615_v16  ;;  %v1622_v28 = vrot.slane %v5675_v9, 2  ;;  %v5696_v29 = vshrl.u32 %v5670_v5, 16  ;;  %v505_v32 = vor.u32 %v5653_v58, %v501_v2 }
  0x24   : > { %v1620_v31 = vsel %vm1597_vm3, %v1615_v16, %v1619_v17  ;;  %v1626_v34 = vrot.slane %v5689_v19, 2  ;;  %v513_v36 = vor.u32 %v5659_v60, %v509_v18  ;;  %v517_v39 = vrot.slane %v5675_v9, 1 }
  0x25   : > { %4722 = vmatmul.mubr.msk.bf16.gmra.mrb[4].mxu1 %vm607_vm4, %v494_v12  ;;  %v1625_v40 = vrot.slane %v5696_v29, 1  ;;  %v1623_v41 = vor.u32 %v1622_v28, %v1621_v27  ;;  %v5714_v42 = vshll.u32 %v5699_v30, 16  ;;  %v5717_v43 = vshrl.u32 %v5699_v30, 16 }
  0x26   : > { %4725 = vmatprep.mubr.msk.bf16.mxu1 %vm607_vm4, %v502_v8  ;;  %v510_v44 = vsel %vm458_vm2, %v505_v32, %v509_v18  ;;  %v5726_v48 = vshll.u32 %v5706_v35, 16  ;;  %v5729_v49 = vshrl.u32 %v5706_v35, 16  ;;  %v518_v51 = vsel %vm458_vm2, %v513_v36, %v517_v39 }
  0x27   : > { %4874 = vmatmul.mubr.msk.bf16.gmra.mrb[4].mxu0 %vm607_vm4, %v1616_v26  ;;  %v1627_v45 = vor.u32 %v1626_v34, %v1625_v40  ;;  %v1624_v52 = vsel %vm1597_vm3, %v1619_v17, %v1623_v41  ;;  %v525_v53 = vrot.slane %v5689_v19, 1  ;;  %v1629_v54 = vrot.slane %v5717_v43, 1  ;;  %v5771_v40 = vld [vmem:[%s5569_s30 + $0x68] sm:$0xff]  }
  0x28   : > { %4877 = vmatprep.mubr.msk.bf16.mxu0 %vm607_vm4, %v1620_v31  ;;  %v1630_v57 = vrot.slane %v5714_v42, 2  ;;  %v521_v63 = vor.u32 %v5678_v10, %v517_v39  ;;  %v1633_v0 = vrot.slane %v5729_v49, 1  ;;  %v1634_v1 = vrot.slane %v5726_v48, 2  ;;  %v5763_v31 = vld [vmem:[%s5569_s30 + $0x60] sm:$0xff]  }
  0x29   : > { %v1628_v62 = vsel %vm1597_vm3, %v1623_v41, %v1627_v45  ;;  %v529_v2 = vor.u32 %v5696_v29, %v525_v53  ;;  %v533_v3 = vrot.slane %v5714_v42, 1  ;;  %v5750_v11 = vshll.u32 %v5738_v61, 16 }
  0x2a   : > { %v1631_v7 = vor.u32 %v1630_v57, %v1629_v54  ;;  %v5753_v12 = vshrl.u32 %v5738_v61, 16  ;;  %v526_v16 = vsel %vm458_vm2, %v521_v63, %v525_v53  ;;  %v1635_v8 = vor.u32 %v1634_v1, %v1633_v0  ;;  %v5795_v0 = vld [vmem:[%s5569_s30 + $0x70] sm:$0xff]  }
  0x2b   : > { %8035 = vst [vmem:[#allocation2_spill] sm:$0xff] %v5750_v11  ;;  %v534_v17 = vsel %vm458_vm2, %v529_v2, %v533_v3  ;;  %v541_v26 = vrot.slane %v5726_v48, 1  ;;  %v1638_v28 = vrot.slane %v5750_v11, 2  ;;  %v537_v34 = vor.u32 %v5717_v43, %v533_v3 }
  0x2c   : > { %8036 = vst [vmem:[#allocation3_spill] sm:$0xff] %v5753_v12  ;;  %v1632_v18 = vsel %vm1597_vm3, %v1627_v45, %v1631_v7  ;;  %v1637_v27 = vrot.slane %v5753_v12, 1  ;;  %v1636_v32 = vsel %vm1597_vm3, %v1631_v7, %v1635_v8  ;;  %v549_v39 = vrot.slane %v5750_v11, 1 }
  0x2d   : > { %4726 = vmatmul.mubr.msk.bf16.gmra.mrb[8].mxu1 %vm607_vm4, %v510_v44  ;;  %v545_v36 = vor.u32 %v5729_v49, %v541_v26  ;;  %v5778_v44 = vshll.u32 %v5763_v31, 16  ;;  %v542_v45 = vsel %vm458_vm2, %v537_v34, %v541_v26  ;;  %v5785_v54 = vshrl.u32 %v5763_v31, 16 }
  0x2e   : > { %4729 = vmatprep.mubr.msk.bf16.mxu1 %vm607_vm4, %v518_v51  ;;  %v5775_v41 = vor.u32 %v1638_v28, %v1637_v27  ;;  %v1953_v51 = vrot.slane %v5582_v14, 2  ;;  %v5788_v57 = vshll.u32 %v5771_v40, 16  ;;  %v553_v2 = vor.u32 %v5753_v12, %v549_v39 }
  0x2f   : > { %4878 = vmatmul.mubr.msk.bf16.gmra.mrb[8].mxu0 %vm607_vm4, %v1624_v52  ;;  %8038 = vst [vmem:[#allocation5_spill] sm:$0xff] %v5778_v44  ;;  %v1954_v52 = vrot.slane %v5585_v15, 2  ;;  %v550_v53 = vsel %vm458_vm2, %v545_v36, %v549_v39  ;;  %8039 = vst [vmem:[#allocation6_spill] sm:$0xff] %v5785_v54  ;;  %v557_v63 = vrot.slane %v5778_v44, 1  ;;  %v1958_v26 = vrot.slane %v5601_v23, 2  ;;  %v5888_v44 = vld [vmem:[%s5722_s12] sm:$0xff]  }
  0x30   : > { %4881 = vmatprep.mubr.msk.bf16.mxu0 %vm607_vm4, %v1628_v62  ;;  %8037 = vst [vmem:[#allocation4_spill] sm:$0xff] %v5775_v41  ;;  %8040 = vst [vmem:[#allocation7_spill] sm:$0xff] %v5788_v57  ;;  %v1640_v62 = vsel %vm1597_vm3, %v1635_v8, %v5775_v41  ;;  %v565_v7 = vrot.slane %v5788_v57, 1  ;;  %v1956_v8 = vrot.slane %v5598_v22, 2  ;;  %v5814_v27 = vshrl.u32 %v5771_v40, 16 }
  0x31   : > { %v1955_v1 = vsel %vm1952_vm5, %v1953_v51, %v1954_v52  ;;  %v561_v3 = vor.u32 %v5785_v54, %v557_v63  ;;  %v4429_v36 = vld [vmem:[%s7956_s2 + $0xe] sm:$0x3]  ;;  %v5832_v51 = vld [vmem:[%s5569_s30 + $0x80] sm:$0xff]   ;;  %v2493_v11 = vrot.slane %v5637_v50, 2  ;;  %v2494_v12 = vrot.slane %v5628_v46, 3 }
  0x32   : > { %8042 = vst [vmem:[#allocation9_spill] sm:$0xff] %v5814_v27  ;;  %v5828_v39 = vsel %vm1952_vm5, %v1954_v52, %v1956_v8  ;;  %v5867_v41 = vshrl.u32 %v5832_v51, 16 }
  0x33   : > { %v566_v28 = vsel %vm458_vm2, %v561_v3, %v565_v7  ;;  %v1960_v3 = vrot.slane %v5619_v38, 2 }
  0x34   : > { %8047 = vst [vmem:[#allocation14_spill] sm:$0xff] %v5867_v41 }
  0x35   : > { %4730 = vmatmul.mubr.msk.bf16.gmra.mrb[12].mxu1 %vm607_vm4, %v526_v16  ;;  %v5803_v16 = vld [vmem:[%s5569_s30 + $0x78] sm:$0xff]  }
  0x36   : > { %4733 = vmatprep.mubr.msk.bf16.mxu1 %vm607_vm4, %v534_v17  ;;  %v5809_v17 = vshll.u32 %v5795_v0, 16  ;;  %v5821_v34 = vshll.u32 %v5803_v16, 16 }
  0x37   : > { %4882 = vmatmul.mubr.msk.bf16.gmra.mrb[12].mxu0 %vm607_vm4, %v1632_v18  ;;  %v558_v18 = vsel %vm458_vm2, %v553_v2, %v557_v63  ;;  %v5840_v63 = vand.u32 %v4429_v36, %v5543_v4  ;;  %v5845_v2 = vld [vmem:[%s5569_s30 + $0x88] sm:$0xff]   ;;  %v5862_v36 = vshrl.u32 %v5803_v16, 16 }
  0x38   : > { %4885 = vmatprep.mubr.msk.bf16.mxu0 %vm607_vm4, %v1636_v32  ;;  %8041 = vst [vmem:[#allocation8_spill] sm:$0xff] %v5809_v17  ;;  %v5818_v32 = vshrl.u32 %v5795_v0, 16  ;;  %8044 = vst [vmem:[#allocation11_spill] sm:$0xff] %v5821_v34  ;;  %v581_v52 = vrot.slane %v5821_v34, 1  ;;  %v5870_v34 = vshll.u32 %v5845_v2, 16 }
  0x39   : > { %8046 = vst [vmem:[#allocation13_spill] sm:$0xff] %v5862_v36 }
  0x3a   : > { %8043 = vst [vmem:[#allocation10_spill] sm:$0xff] %v5818_v32  ;;  %8048 = vst [vmem:[#allocation15_spill] sm:$0xff] %v5870_v34 }
  0x3d   : > { %4734 = vmatmul.mubr.msk.bf16.gmra.mrb[16].mxu1 %vm607_vm4, %v542_v45  ;;  %v573_v45 = vrot.slane %v5809_v17, 1  ;;  %v5873_v17 = vld [vmem:[%s5722_s12 + $0x10] sm:$0xff]  }
  0x3e   : > { %4737 = vmatprep.mubr.msk.bf16.mxu1 %vm607_vm4, %v550_v53  ;;  %v5836_v53 = vsel %vm1952_vm5, %v1956_v8, %v1958_v26  ;;  %v5857_v8 = vld [vmem:[%s5722_s12 + $0x8] sm:$0xff]   ;;  %8049 = vst [vmem:[#allocation16_spill] sm:$0xff] %v5873_v17  ;;  %v2262_v57 = vrot.slane %v5873_v17, 2  ;;  %v1966_v17 = vrot.slane %v5670_v5, 2 }
  0x3f   : > { %4886 = vmatmul.mubr.msk.bf16.gmra.mrb[16].mxu0 %vm607_vm4, %v1640_v62  ;;  %v569_v62 = vor.u32 %v5814_v27, %v565_v7  ;;  %v5854_v7 = vshll.u32 %v5832_v51, 16  ;;  %v585_v27 = vor.u32 %v5862_v36, %v581_v52  ;;  %v5912_v36 = vshll.u32 %v5888_v44, 16 }
  0x40   : > { %4907 = vmatprep.mubr.msk.bf16.mxu0 %vm607_vm4, %v1955_v1  ;;  %v577_v1 = vor.u32 %v5818_v32, %v573_v45  ;;  %v7978_v32 = vrot.slane %v5857_v8, 2 }
  0x41   : > { %8045 = vst [vmem:[#allocation12_spill] sm:$0xff] %v5854_v7  ;;  %v605_v50 = vrot.slane %v5912_v36, 1 }
  0x45   : > { %4738 = vmatmul.mubr.msk.bf16.gmra.mrb[20].mxu1 %vm607_vm4, %v558_v18  ;;  %v574_v18 = vsel %vm458_vm2, %v569_v62, %v573_v45  ;;  %v5877_v45 = vsel %vm1952_vm5, %v1958_v26, %v1960_v3  ;;  %v589_v62 = vrot.slane %v5854_v7, 1  ;;  %v597_v26 = vrot.slane %v5870_v34, 1 }
  0x46   : > { %4741 = vmatprep.mubr.msk.bf16.mxu1 %vm607_vm4, %v566_v28  ;;  %v1962_v28 = vrot.slane %v5631_v47, 2  ;;  %v5895_v7 = vsel %vm1952_vm5, %v7978_v32, %v2262_v57  ;;  %v5906_v34 = vshrl.u32 %v5845_v2, 16  ;;  %v2489_v57 = vrot.slane %v5616_v37, 2 }
  0x47   : > { %4908 = vmatmul.mubr.msk.bf16.vlgmr.msra.gmra.mrb[0].mxu0 %vm607_vm4, %v5828_v39  ;;  %v2490_v32 = vrot.slane %v5613_v33, 3 }
  0x48   : > { %4944 = vmatpush3.bf16.msra.mxu0 %v5604_v24  ;;  %4911 = vmatprep.mubr.msk.bf16.mxu0 %vm607_vm4, %v5836_v53  ;;  %v582_v24 = vsel %vm458_vm2, %v577_v1, %v581_v52  ;;  %v5884_v1 = vsel %vm1952_vm5, %v1960_v3, %v1962_v28  ;;  %v2486_v3 = vrot.slane %v5595_v21, 2  ;;  %v2487_v52 = vrot.slane %v5592_v20, 3 }
  0x49   : > { %4981 = vmatprep.subr.bf16.mxu0 %v5840_v63  ;;  %v2491_v54 = vor.u32 %v2490_v32, %v2489_v57  ;;  %v601_v32 = vor.u32 %v5906_v34, %v597_v26  ;;  %v2506_v57 = vrot.slane %v5675_v9, 3 }
  0x4a   : > { %v2488_v21 = vor.u32 %v2487_v52, %v2486_v3 }
  0x4c   : > { %v5922_v33 = vsel %vm2485_vm6, %v2488_v21, %v2491_v54  ;;  %v1972_v21 = vrot.slane %v5738_v61, 2 }
  0x4d   : > { %4742 = vmatmul.mubr.msk.bf16.gmra.mrb[24].mxu1 %vm607_vm4, %v574_v18  ;;  %v593_v18 = vor.u32 %v5867_v41, %v589_v62  ;;  %v590_v41 = vsel %vm458_vm2, %v585_v27, %v589_v62  ;;  %v2495_v27 = vor.u32 %v2494_v12, %v2493_v11  ;;  %v1968_v11 = vrot.slane %v5699_v30, 2 }
  0x4e   : > { %4745 = vmatprep.mubr.msk.bf16.mxu1 %vm607_vm4, %v582_v24  ;;  %v1964_v24 = vrot.slane %v5648_v56, 2  ;;  %v2497_v12 = vrot.slane %v5653_v58, 2 }
  0x4f   : > { %4912 = vmatmul.mubr.msk.bf16.gmra.mrb[4].mxu0 %vm607_vm4, %v5877_v45  ;;  %v598_v20 = vsel %vm458_vm2, %v593_v18, %v597_v26  ;;  %v5931_v46 = vsel %vm2485_vm6, %v2491_v54, %v2495_v27  ;;  %v1970_v18 = vrot.slane %v5706_v35, 2  ;;  %v2501_v54 = vrot.slane %v5659_v60, 2 }
  0x50   : > { %4915 = vmatprep.mubr.msk.bf16.mxu0 %vm607_vm4, %v5884_v1  ;;  %v5919_v37 = vsel %vm1952_vm5, %v1962_v28, %v1964_v24  ;;  %v5926_v62 = vsel %vm1952_vm5, %v1964_v24, %v1966_v17  ;;  %v606_v28 = vsel %vm458_vm2, %v601_v32, %v605_v50  ;;  %v2502_v24 = vrot.slane %v5656_v59, 3  ;;  %v4353_v59 = vld [vmem:[%s7956_s2 + $0x6] sm:$0x3] }
  0x51   : > { %v5946_v3 = vsel %vm1952_vm5, %v1966_v17, %v1968_v11  ;;  %v2505_v17 = vrot.slane %v5678_v10, 2  ;;  %v5971_v32 = vand.u32 %v4353_v59, %v5543_v4  ;;  %v2509_v50 = vrot.slane %v5696_v29, 2 }
  0x52   : > { %v2503_v58 = vor.u32 %v2502_v24, %v2501_v54  ;;  %v5981_v9 = vsel %vm1952_vm5, %v1970_v18, %v1972_v21  ;;  %v2513_v29 = vrot.slane %v5717_v43, 2  ;;  %v2517_v54 = vrot.slane %v5729_v49, 2 }
  0x53   : > { %v2518_v24 = vrot.slane %v5726_v48, 3  ;;  %v1980_v49 = vrot.slane %v5803_v16, 2 }
  0x55   : > { %4746 = vmatmul.mubr.msk.bf16.gmra.mrb[28].mxu1 %vm607_vm4, %v590_v41  ;;  %v2498_v41 = vrot.slane %v5645_v55, 3  ;;  %v5954_v55 = vsel %vm1952_vm5, %v1968_v11, %v1970_v18  ;;  %v2510_v11 = vrot.slane %v5689_v19, 3  ;;  %v1976_v18 = vrot.slane %v5771_v40, 2 }
  0x56   : > { %4749 = vmatprep.mubr.msk.bf16.mxu1 %vm607_vm4, %v598_v20  ;;  %v1974_v20 = vrot.slane %v5763_v31, 2  ;;  %v6011_v43 = vor.u32 %v2518_v24, %v2517_v54 }
  0x57   : > { %4916 = vmatmul.mubr.msk.bf16.gmra.mrb[8].mxu0 %vm607_vm4, %v5919_v37  ;;  %v2499_v26 = vor.u32 %v2498_v41, %v2497_v12  ;;  %v2511_v10 = vor.u32 %v2510_v11, %v2509_v50 }
  0x58   : > { %4919 = vmatprep.mubr.msk.bf16.mxu0 %vm607_vm4, %v5926_v62  ;;  %v5986_v41 = vsel %vm1952_vm5, %v1972_v21, %v1974_v20 }
  0x59   : > { %v5949_v52 = vsel %vm2485_vm6, %v2495_v27, %v2499_v26  ;;  %v5962_v60 = vsel %vm2485_vm6, %v2499_v26, %v2503_v58  ;;  %v2507_v27 = vor.u32 %v2506_v57, %v2505_v17  ;;  %v1978_v26 = vrot.slane %v5795_v0, 2 }
  0x5a   : > { %v1982_v17 = vrot.slane %v5832_v51, 2 }
  0x5b   : > { %v5976_v12 = vsel %vm2485_vm6, %v2503_v58, %v2507_v27  ;;  %v5991_v19 = vsel %vm2485_vm6, %v2507_v27, %v2511_v10  ;;  %v6016_v59 = vsel %vm1952_vm5, %v1976_v18, %v1978_v26  ;;  %v1981_v57 = vsel %vm1952_vm5, %v1978_v26, %v1980_v49 }
  0x5c   : > { %v6034_v21 = vsel %vm1952_vm5, %v1980_v49, %v1982_v17  ;;  %v1986_v27 = vrot.slane %v5888_v44, 2  ;;  %v1080_v26 = vrot.slane %v5670_v5, 1 }
  0x5d   : > { %4750 = vmatmul.mubr.msk.bf16.gmra.mrb[32].mxu1 %vm607_vm4, %v606_v28  ;;  %v2514_v28 = vrot.slane %v5714_v42, 3  ;;  %v6009_v42 = vsel %vm1952_vm5, %v1974_v20, %v1976_v18  ;;  %v1984_v20 = vrot.slane %v5845_v2, 2 }
  0x5e   : > { %4755 = vmatprep.mubr.msk.bf16.mxu1 %vm607_vm4, %v5579_v13 }
  0x5f   : > { %4920 = vmatmul.mubr.msk.bf16.gmra.mrb[12].mxu0 %vm607_vm4, %v5946_v3  ;;  %v1985_v50 = vsel %vm1952_vm5, %v1982_v17, %v1984_v20  ;;  %v6047_v11 = vsel %vm1952_vm5, %v1984_v20, %v1986_v27  ;;  %v1672_v20 = vshrl.u32 %v5857_v8, 16 }
  0x60   : > { %4923 = vmatprep.mubr.msk.bf16.mxu0 %vm607_vm4, %v5954_v55 }
  0x65   : > { %4756 = vmatmul.mubr.msk.bf16.vlgmr.msra.gmra.mrb[0].mxu1 %vm607_vm4, %v5582_v14 }
  0x66   : > { %4759 = vmatprep.mubr.msk.bf16.mxu1 %vm607_vm4, %v5585_v15  ;;  %4792 = vmatpush3.bf16.msra.mxu1 %v5607_v25  ;;  %v2515_v25 = vor.u32 %v2514_v28, %v2513_v29  ;;  %v4448_v28 = vld [vmem:[%s7956_s2 + $0x10] sm:$0x3] }
  0x67   : > { %4829 = vmatprep.subr.bf16.mxu1 %v5971_v32  ;;  %4924 = vmatmul.mubr.msk.bf16.gmra.mrb[16].mxu0 %vm607_vm4, %v5981_v9  ;;  %v6073_v18 = vand.u32 %v4448_v28, %v5543_v4  ;;  %v1065_v4 = vrot.slane %v5579_v13, 1  ;;  %v1070_v13 = vrot.slane %v5598_v22, 1  ;;  %v1094_v28 = vrot.slane %v5803_v16, 1 }
  0x68   : > { %4927 = vmatprep.mubr.msk.bf16.mxu0 %vm607_vm4, %v5986_v41  ;;  %v6004_v58 = vsel %vm2485_vm6, %v2511_v10, %v2515_v25  ;;  %v6020_v48 = vsel %vm2485_vm6, %v2515_v25, %v6011_v43  ;;  %v8050_v10 = vrot.slane %v5857_v8, 2  ;;  %v1082_v25 = vrot.slane %v5699_v30, 1 }
  0x6a   : > { %v6057_v29 = vsel %vm1952_vm5, %v1986_v27, %v8050_v10  ;;  %v6161_v24 = vsel %vm1064_vm7, %v1080_v26, %v1082_v25  ;;  %v1675_v27 = vshll.u32 %v5857_v8, 16 }
  0x6d   : > { %4760 = vmatmul.mubr.msk.bf16.gmra.mrb[4].mxu1 %vm607_vm4, %v5598_v22 }
  0x6e   : > { %4763 = vmatprep.mubr.msk.bf16.mxu1 %vm607_vm4, %v5601_v23 }
  0x6f   : > { %4928 = vmatmul.mubr.msk.bf16.gmra.mrb[20].mxu0 %vm607_vm4, %v6009_v42 }
  0x70   : > { %4931 = vmatprep.mubr.msk.bf16.mxu0 %vm607_vm4, %v6016_v59 }
  0x75   : > { %4764 = vmatmul.mubr.msk.bf16.gmra.mrb[8].mxu1 %vm607_vm4, %v5619_v38 }
  0x76   : > { %4767 = vmatprep.mubr.msk.bf16.mxu1 %vm607_vm4, %v5631_v47 }
  0x77   : > { %4932 = vmatmul.mubr.msk.bf16.gmra.mrb[24].mxu0 %vm607_vm4, %v1981_v57 }
  0x78   : > { %4935 = vmatprep.mubr.msk.bf16.mxu0 %vm607_vm4, %v6034_v21 }
  0x7d   : > { %4768 = vmatmul.mubr.msk.bf16.gmra.mrb[12].mxu1 %vm607_vm4, %v5648_v56 }
  0x7e   : > { %4771 = vmatprep.mubr.msk.bf16.mxu1 %vm607_vm4, %v5670_v5 }
  0x7f   : > { %4936 = vmatmul.mubr.msk.bf16.gmra.mrb[28].mxu0 %vm607_vm4, %v1985_v50 }
  0x80   : > { %4939 = vmatprep.mubr.msk.bf16.mxu0 %vm607_vm4, %v6047_v11 }
  0x85   : > { %4772 = vmatmul.mubr.msk.bf16.gmra.mrb[16].mxu1 %vm607_vm4, %v5699_v30 }
  0x86   : > { %4775 = vmatprep.mubr.msk.bf16.mxu1 %vm607_vm4, %v5706_v35 }
  0x87   : > { %4940 = vmatmul.mubr.msk.bf16.gmra.mrb[32].mxu0 %vm607_vm4, %v6057_v29 }
  0x88   : > { %4945 = vmatprep.mubr.msk.bf16.mxu0 %vm607_vm4, %v5828_v39  ;;  %v1066_v39 = vrot.slane %v5582_v14, 1 }
  0x8d   : > { %4776 = vmatmul.mubr.msk.bf16.gmra.mrb[20].mxu1 %vm607_vm4, %v5738_v61 }
  0x8e   : > { %4779 = vmatprep.mubr.msk.bf16.mxu1 %vm607_vm4, %v5763_v31 }
  0x8f   : > { %4946 = vmatmul.mubr.msk.bf16.vlgmr.msra.gmra.mrb[0].mxu0 %vm607_vm4, %v5836_v53  ;;  %v1067_v53 = vsel %vm1064_vm7, %v1065_v4, %v1066_v39 }
  0x90   : > { %4982 = vmatpush3.bf16.msra.mxu0 %v5840_v63  ;;  %4949 = vmatprep.mubr.msk.bf16.mxu0 %vm607_vm4, %v5877_v45  ;;  %v1068_v63 = vrot.slane %v5585_v15, 1 }
  0x91   : > { %5019 = vmatprep.subr.bf16.mxu0 %v6073_v18 }
  0x92   : > { %v6110_v14 = vsel %vm1064_vm7, %v1066_v39, %v1068_v63  ;;  %v6113_v45 = vsel %vm1064_vm7, %v1068_v63, %v1070_v13  ;;  %v1100_v63 = vrot.slane %v5888_v44, 1 }
  0x95   : > { %4780 = vmatmul.mubr.msk.bf16.gmra.mrb[24].mxu1 %vm607_vm4, %v5771_v40 }
  0x96   : > { %4783 = vmatprep.mubr.msk.bf16.mxu1 %vm607_vm4, %v5795_v0 }
  0x97   : > { %4950 = vmatmul.mubr.msk.bf16.gmra.mrb[4].mxu0 %vm607_vm4, %v5884_v1  ;;  %v1072_v1 = vrot.slane %v5601_v23, 1 }
  0x98   : > { %4953 = vmatprep.mubr.msk.bf16.mxu0 %vm607_vm4, %v5919_v37  ;;  %v1074_v37 = vrot.slane %v5619_v38, 1 }
  0x9d   : > { %4784 = vmatmul.mubr.msk.bf16.gmra.mrb[28].mxu1 %vm607_vm4, %v5803_v16 }
  0x9e   : > { %4787 = vmatprep.mubr.msk.bf16.mxu1 %vm607_vm4, %v5832_v51 }
  0x9f   : > { %4954 = vmatmul.mubr.msk.bf16.gmra.mrb[8].mxu0 %vm607_vm4, %v5926_v62  ;;  %v6128_v62 = vsel %vm1064_vm7, %v1070_v13, %v1072_v1  ;;  %v8051_v13 = vld [vmem:[#allocation3_spill] sm:$0xff] }
  0xa0   : > { %4957 = vmatprep.mubr.msk.bf16.mxu0 %vm607_vm4, %v5946_v3  ;;  %v6131_v3 = vsel %vm1064_vm7, %v1072_v1, %v1074_v37  ;;  %v2521_v1 = vrot.slane %v8051_v13, 2  ;;  %v8058_v13 = vld [vmem:[#allocation8_spill] sm:$0xff] }
  0xa5   : > { %4788 = vmatmul.mubr.msk.bf16.gmra.mrb[32].mxu1 %vm607_vm4, %v5845_v2 }
  0xa6   : > { %4793 = vmatprep.mubr.msk.bf16.mxu1 %vm607_vm4, %v1067_v53  ;;  %v1096_v53 = vrot.slane %v5832_v51, 1 }
  0xa7   : > { %4958 = vmatmul.mubr.msk.bf16.gmra.mrb[12].mxu0 %vm607_vm4, %v5954_v55  ;;  %v1076_v55 = vrot.slane %v5631_v47, 1 }
  0xa8   : > { %4961 = vmatprep.mubr.msk.bf16.mxu0 %vm607_vm4, %v5981_v9 }
  0xa9   : > { %v6143_v9 = vsel %vm1064_vm7, %v1074_v37, %v1076_v55 }
  0xad   : > { %4794 = vmatmul.mubr.msk.bf16.vlgmr.msra.gmra.mrb[0].mxu1 %vm607_vm4, %v6110_v14 }
  0xae   : > { %4797 = vmatprep.mubr.msk.bf16.mxu1 %vm607_vm4, %v6113_v45  ;;  %4830 = vmatpush3.bf16.msra.mxu1 %v5971_v32  ;;  %v1078_v32 = vrot.slane %v5648_v56, 1 }
  0xaf   : > { %5057 = vmatprep.subr.bf16.mxu1 %v5551_v6  ;;  %4962 = vmatmul.mubr.msk.bf16.gmra.mrb[16].mxu0 %vm607_vm4, %v5986_v41 }
  0xb0   : > { %4965 = vmatprep.mubr.msk.bf16.mxu0 %vm607_vm4, %v6009_v42  ;;  %v6146_v41 = vsel %vm1064_vm7, %v1076_v55, %v1078_v32  ;;  %v6158_v54 = vsel %vm1064_vm7, %v1078_v32, %v1080_v26  ;;  %v1084_v42 = vrot.slane %v5706_v35, 1  ;;  %v8053_v32 = vld [vmem:[#allocation6_spill] sm:$0xff] }
  0xb1   : > { %v2525_v26 = vrot.slane %v8053_v32, 2 }
  0xb2   : > { %v6174_v49 = vsel %vm1064_vm7, %v1082_v25, %v1084_v42  ;;  %v8054_v25 = vld [vmem:[#allocation5_spill] sm:$0xff] }
  0xb5   : > { %4798 = vmatmul.mubr.msk.bf16.gmra.mrb[4].mxu1 %vm607_vm4, %v6128_v62 }
  0xb6   : > { %4801 = vmatprep.mubr.msk.bf16.mxu1 %vm607_vm4, %v6131_v3 }
  0xb7   : > { %4966 = vmatmul.mubr.msk.bf16.gmra.mrb[20].mxu0 %vm607_vm4, %v6016_v59  ;;  %v1086_v59 = vrot.slane %v5738_v61, 1 }
  0xb8   : > { %4969 = vmatprep.mubr.msk.bf16.mxu0 %vm607_vm4, %v1981_v57  ;;  %v1088_v57 = vrot.slane %v5763_v31, 1 }
  0xb9   : > { %v6177_v17 = vsel %vm1064_vm7, %v1084_v42, %v1086_v59  ;;  %v2526_v42 = vrot.slane %v8054_v25, 3 }
  0xba   : > { %v6200_v10 = vsel %vm1064_vm7, %v1086_v59, %v1088_v57 }
  0xbd   : > { %4802 = vmatmul.mubr.msk.bf16.gmra.mrb[8].mxu1 %vm607_vm4, %v6143_v9 }
  0xbe   : > { %4805 = vmatprep.mubr.msk.bf16.mxu1 %vm607_vm4, %v6146_v41 }
  0xbf   : > { %4970 = vmatmul.mubr.msk.bf16.gmra.mrb[24].mxu0 %vm607_vm4, %v6034_v21  ;;  %v1090_v21 = vrot.slane %v5771_v40, 1 }
  0xc0   : > { %4973 = vmatprep.mubr.msk.bf16.mxu0 %vm607_vm4, %v1985_v50  ;;  %v6193_v50 = vrot.slane %v1672_v20, 1 }
  0xc5   : > { %4806 = vmatmul.mubr.msk.bf16.gmra.mrb[12].mxu1 %vm607_vm4, %v6158_v54 }
  0xc6   : > { %4809 = vmatprep.mubr.msk.bf16.mxu1 %vm607_vm4, %v6161_v24 }
  0xc7   : > { %4974 = vmatmul.mubr.msk.bf16.gmra.mrb[28].mxu0 %vm607_vm4, %v6047_v11  ;;  %v6197_v11 = vrot.slane %v1675_v27, 2 }
  0xc8   : > { %4977 = vmatprep.mubr.msk.bf16.mxu0 %vm607_vm4, %v6057_v29  ;;  %v6203_v29 = vsel %vm1064_vm7, %v1088_v57, %v1090_v21  ;;  %v8056_v57 = vld [vmem:[#allocation7_spill] sm:$0xff] }
  0xcd   : > { %4810 = vmatmul.mubr.msk.bf16.gmra.mrb[16].mxu1 %vm607_vm4, %v6174_v49 }
  0xce   : > { %4813 = vmatprep.mubr.msk.bf16.mxu1 %vm607_vm4, %v6177_v17 }
  0xcf   : > { %4978 = vmatmul.mubr.msk.bf16.gmra.mrb[32].mxu0 %vm607_vm4, %v5895_v7  ;;  %v1678_v7 = vor.u32 %v6197_v11, %v6193_v50  ;;  %v3225_v50 = vlaneseq }
  0xd0   : > { %4983 = vmatprep.mubr.msk.bf16.mxu0 %vm607_vm4, %v5922_v33  ;;  %v1092_v33 = vrot.slane %v5795_v0, 1 }
  0xd1   : > { %v6433_v11 = vshrl.u32 %v3225_v50, 7 }
  0xd2   : > { %v6219_v4 = vsel %vm1064_vm7, %v1090_v21, %v1092_v33  ;;  %v6222_v39 = vsel %vm1064_vm7, %v1092_v33, %v1094_v28  ;;  %v2530_v21 = vrot.slane %v8056_v57, 3  ;;  %v2527_v33 = vor.u32 %v2526_v42, %v2525_v26 }
  0xd5   : > { %4814 = vmatmul.mubr.msk.bf16.gmra.mrb[20].mxu1 %vm607_vm4, %v6200_v10 }
  0xd6   : > { %4817 = vmatprep.mubr.msk.bf16.mxu1 %vm607_vm4, %v6203_v29 }
  0xd7   : > { %4984 = vmatmul.mubr.msk.bf16.vlgmr.msra.gmra.mrb[0].mxu0 %vm607_vm4, %v5931_v46  ;;  %v1098_v46 = vrot.slane %v5845_v2, 1 }
  0xd8   : > { %5020 = vmatpush3.bf16.msra.mxu0 %v6073_v18  ;;  %4987 = vmatprep.mubr.msk.bf16.mxu0 %vm607_vm4, %v5949_v52  ;;  %v6235_v52 = vsel %vm1064_vm7, %v1094_v28, %v1096_v53 }
  0xd9   : > { %v6238_v18 = vsel %vm1064_vm7, %v1096_v53, %v1098_v46 }
  0xdd   : > { %4818 = vmatmul.mubr.msk.bf16.gmra.mrb[24].mxu1 %vm607_vm4, %v6219_v4 }
  0xde   : > { %4821 = vmatprep.mubr.msk.bf16.mxu1 %vm607_vm4, %v6222_v39 }
  0xdf   : > { %4988 = vmatmul.mubr.msk.bf16.gmra.mrb[4].mxu0 %vm607_vm4, %v5962_v60  ;;  %v8052_v60 = vld [vmem:[#allocation2_spill] sm:$0xff] }
  0xe0   : > { %4991 = vmatprep.mubr.msk.bf16.mxu0 %vm607_vm4, %v5976_v12  ;;  %v2522_v37 = vrot.slane %v8052_v60, 3  ;;  %v6254_v12 = vsel %vm1064_vm7, %v1098_v46, %v1100_v63 }
  0xe2   : > { %v2523_v55 = vor.u32 %v2522_v37, %v2521_v1  ;;  %v8060_v37 = vld [vmem:[#allocation11_spill] sm:$0xff] }
  0xe3   : > { %v2538_v26 = vrot.slane %v8060_v37, 3 }
  0xe4   : > { %v2528_v53 = vsel %vm2485_vm6, %v2523_v55, %v2527_v33 }
  0xe5   : > { %4822 = vmatmul.mubr.msk.bf16.gmra.mrb[28].mxu1 %vm607_vm4, %v6235_v52 }
  0xe6   : > { %4825 = vmatprep.mubr.msk.bf16.mxu1 %vm607_vm4, %v6238_v18 }
  0xe7   : > { %4992 = vmatmul.mubr.msk.bf16.gmra.mrb[8].mxu0 %vm607_vm4, %v5991_v19  ;;  %v2524_v19 = vsel %vm2485_vm6, %v6011_v43, %v2523_v55  ;;  %v2534_v43 = vrot.slane %v8058_v13, 3 }
  0xe8   : > { %4995 = vmatprep.mubr.msk.bf16.mxu0 %vm607_vm4, %v6004_v58  ;;  %v8055_v58 = vld [vmem:[#allocation9_spill] sm:$0xff] }
  0xe9   : > { %v2529_v59 = vrot.slane %v8055_v58, 2 }
  0xeb   : > { %v2531_v28 = vor.u32 %v2530_v21, %v2529_v59  ;;  %v8062_v59 = vld [vmem:[#allocation12_spill] sm:$0xff] }
  0xec   : > { %v2542_v21 = vrot.slane %v8062_v59, 3 }
  0xed   : > { %4826 = vmatmul.mubr.msk.bf16.gmra.mrb[32].mxu1 %vm607_vm4, %v6254_v12  ;;  %v2532_v1 = vsel %vm2485_vm6, %v2527_v33, %v2531_v28  ;;  %v2545_v33 = vrot.slane %v5906_v34, 2 }
  0xee   : > { %4831 = vmatprep.mubr.msk.bf16.mxu1 %vm607_vm4, %v6110_v14  ;;  %v8057_v14 = vld [vmem:[#allocation10_spill] sm:$0xff] }
  0xef   : > { %4996 = vmatmul.mubr.msk.bf16.gmra.mrb[12].mxu0 %vm607_vm4, %v6020_v48  ;;  %v2533_v46 = vrot.slane %v8057_v14, 2  ;;  %v8059_v48 = vld [vmem:[#allocation13_spill] sm:$0xff] }
  0xf0   : > { %4999 = vmatprep.mubr.msk.bf16.mxu0 %vm607_vm4, %v2524_v19  ;;  %v2537_v60 = vrot.slane %v8059_v48, 2 }
  0xf2   : > { %v2539_v55 = vor.u32 %v2538_v26, %v2537_v60  ;;  %v2550_v60 = vrot.slane %v5912_v36, 3 }
  0xf5   : > { %4832 = vmatmul.mubr.msk.bf16.vlgmr.msra.gmra.mrb[0].mxu1 %vm607_vm4, %v6113_v45  ;;  %v2535_v45 = vor.u32 %v2534_v43, %v2533_v46 }
  0xf6   : > { %4835 = vmatprep.mubr.msk.bf16.mxu1 %vm607_vm4, %v6128_v62  ;;  %5058 = vmatpush3.bf16.msra.mxu1 %v5551_v6  ;;  %v8061_v62 = vld [vmem:[#allocation14_spill] sm:$0xff] }
  0xf7   : > { %5000 = vmatmul.mubr.msk.bf16.gmra.mrb[16].mxu0 %vm607_vm4, %v2528_v53  ;;  %v2536_v42 = vsel %vm2485_vm6, %v2531_v28, %v2535_v45  ;;  %v2541_v19 = vrot.slane %v8061_v62, 2  ;;  %v2540_v6 = vsel %vm2485_vm6, %v2535_v45, %v2539_v55  ;;  %v8063_v53 = vld [vmem:[#allocation15_spill] sm:$0xff]  ;;  %v1665_v28 = vshrl.u32 %v5888_v44, 16 }
  0xf8   : > { %5003 = vmatprep.mubr.msk.bf16.mxu0 %vm607_vm4, %v2532_v1  ;;  %v2546_v1 = vrot.slane %v8063_v53, 3  ;;  %v2553_v45 = vrot.slane %v1672_v20, 2 }
  0xfa   : > { %v2547_v46 = vor.u32 %v2546_v1, %v2545_v33 }
  0xfd   : > { %4836 = vmatmul.mubr.msk.bf16.gmra.mrb[4].mxu1 %vm607_vm4, %v6131_v3  ;;  %v2543_v3 = vor.u32 %v2542_v21, %v2541_v19 }
  0xfe   : > { %4839 = vmatprep.mubr.msk.bf16.mxu1 %vm607_vm4, %v6143_v9  ;;  %v2549_v9 = vrot.slane %v1665_v28, 2 }
  0xff   : > { %5004 = vmatmul.mubr.msk.bf16.gmra.mrb[20].mxu0 %vm607_vm4, %v2536_v42  ;;  %v2544_v43 = vsel %vm2485_vm6, %v2539_v55, %v2543_v3  ;;  %v2548_v26 = vsel %vm2485_vm6, %v2543_v3, %v2547_v46  ;;  %v2554_v42 = vrot.slane %v1675_v27, 3  ;;  %v8064_v55 = vld [vmem:[#allocation16_spill] sm:$0xff]  ;;  %v2839_v3 = vrot.slane %v5585_v15, 3 }
 0x100   : > { %5007 = vmatprep.mubr.msk.bf16.mxu0 %vm607_vm4, %v2540_v6  ;;  %v2558_v19 = vshrl.u32 %v8064_v55, 16  ;;  %v2561_v21 = vshll.u32 %v8064_v55, 16  ;;  %v2844_v15 = vrot.slane %v5619_v38, 3 }
 0x101   : > { %v2555_v6 = vor.u32 %v2554_v42, %v2553_v45  ;;  %v1649_v42 = vrot.slane %v8057_v14, 1  ;;  %v2860_v14 = vrot.slane %v5771_v40, 3 }
 0x102   : > { %v2560_v33 = vrot.slane %v2558_v19, 2  ;;  %v2563_v20 = vrot.slane %v2561_v21, 3  ;;  %v1654_v21 = vrot.slane %v8060_v37, 2 }
 0x104   : > { %v2564_v1 = vor.u32 %v2563_v20, %v2560_v33  ;;  %v1658_v33 = vrot.slane %v8062_v59, 2  ;;  %v1661_v59 = vrot.slane %v5906_v34, 1  ;;  %v2866_v34 = vrot.slane %v5832_v51, 3 }
 0x105   : > { %4840 = vmatmul.mubr.msk.bf16.gmra.mrb[8].mxu1 %vm607_vm4, %v6146_v41  ;;  %v2551_v41 = vor.u32 %v2550_v60, %v2549_v9  ;;  %v1642_v9 = vrot.slane %v8054_v25, 2  ;;  %v1374_v60 = vrot.slane %v5857_v8, 1  ;;  %v8065_v25 = vld [vmem:[#allocation4_spill] sm:$0xff]  ;;  %v2870_v51 = vrot.slane %v5888_v44, 3 }
 0x106   : > { %4843 = vmatprep.mubr.msk.bf16.mxu1 %vm607_vm4, %v6158_v54 }
 0x107   : > { %5008 = vmatmul.mubr.msk.bf16.gmra.mrb[24].mxu0 %vm607_vm4, %v2544_v43  ;;  %v2552_v54 = vsel %vm2485_vm6, %v2547_v46, %v2551_v41  ;;  %v2556_v27 = vsel %vm2485_vm6, %v2551_v41, %v2555_v6  ;;  %v2840_v43 = vrot.slane %v5598_v22, 3  ;;  %v2842_v46 = vrot.slane %v5601_v23, 3 }
 0x108   : > { %5011 = vmatprep.mubr.msk.bf16.mxu0 %vm607_vm4, %v2548_v26  ;;  %v2848_v23 = vrot.slane %v5648_v56, 3  ;;  %v1641_v56 = vrot.slane %v8053_v32, 1  ;;  %v1645_v32 = vrot.slane %v8055_v58, 1  ;;  %v1650_v41 = vrot.slane %v8058_v13, 2 }
 0x109   : > { %v2843_v22 = vsel %vm2838_vm8, %v2840_v43, %v2842_v46  ;;  %v2858_v58 = vrot.slane %v5763_v31, 3  ;;  %v1653_v13 = vrot.slane %v8059_v48, 1  ;;  %v2862_v48 = vrot.slane %v5795_v0, 3 }
 0x10a   : > { %v1643_v26 = vor.u32 %v1642_v9, %v1641_v56  ;;  %v1651_v19 = vor.u32 %v1650_v41, %v1649_v42  ;;  %v3232_v9 = vadd.s32 48, %v6433_v11 }
 0x10b   : > { %v2861_v31 = vsel %vm2838_vm8, %v2858_v58, %v2860_v14 }
 0x10c   : > { %v1644_v45 = vsel %vm1597_vm3, %v8065_v25, %v1643_v26  ;;  %v3236_v25 = vadd.s32 80, %v6433_v11 }
 0x10d   : > { %4844 = vmatmul.mubr.msk.bf16.gmra.mrb[12].mxu1 %vm607_vm4, %v6161_v24  ;;  %v2565_v24 = vsel %vm2485_vm6, %v2555_v6, %v2564_v1  ;;  %v1662_v1 = vrot.slane %v8063_v53, 2 }
 0x10e   : > { %4847 = vmatprep.mubr.msk.bf16.mxu1 %vm607_vm4, %v6174_v49  ;;  %v2841_v49 = vsel %vm2838_vm8, %v2839_v3, %v2840_v43  ;;  %v1667_v43 = vrot.slane %v1665_v28, 1 }
 0x10f   : > { %5012 = vmatmul.mubr.msk.bf16.gmra.mrb[28].mxu0 %vm607_vm4, %v2552_v54  ;;  %v1657_v54 = vrot.slane %v8061_v62, 1  ;;  %v2864_v62 = vrot.slane %v5803_v16, 3  ;;  %v1663_v16 = vor.u32 %v1662_v1, %v1661_v59 }
 0x110   : > { %5015 = vmatprep.mubr.msk.bf16.mxu0 %vm607_vm4, %v2556_v27  ;;  %v1655_v27 = vor.u32 %v1654_v21, %v1653_v13 }
 0x111   : > { %v1659_v40 = vor.u32 %v1658_v33, %v1657_v54  ;;  %v2865_v0 = vsel %vm2838_vm8, %v2862_v48, %v2864_v62 }
 0x112   : > { %v1656_v37 = vsel %vm1597_vm3, %v1651_v19, %v1655_v27 }
 0x113   : > { %v1660_v3 = vsel %vm1597_vm3, %v1655_v27, %v1659_v40  ;;  %v1664_v53 = vsel %vm1597_vm3, %v1659_v40, %v1663_v16 }
 0x115   : > { %4848 = vmatmul.mubr.msk.bf16.gmra.mrb[16].mxu1 %vm607_vm4, %v6177_v17  ;;  %v2845_v17 = vsel %vm2838_vm8, %v2842_v46, %v2844_v15 }
 0x116   : > { %4851 = vmatprep.mubr.msk.bf16.mxu1 %vm607_vm4, %v6200_v10  ;;  %v2846_v10 = vrot.slane %v5631_v47, 3  ;;  %v2852_v47 = vrot.slane %v5699_v30, 3  ;;  %v1375_v30 = vsel %vm1064_vm7, %v1100_v63, %v1374_v60  ;;  %v3230_v60 = vadd.s32 32, %v6433_v11 }
 0x117   : > { %5016 = vmatmul.mubr.msk.bf16.gmra.mrb[32].mxu0 %vm607_vm4, %v2565_v24  ;;  %v1668_v24 = vrot.slane %v5912_v36, 2  ;;  %v2868_v36 = vrot.slane %v5845_v2, 3 }
 0x118   : > { %5021 = vmatprep.mubr.msk.bf16.mxu0 %vm607_vm4, %v2841_v49  ;;  %v2847_v38 = vsel %vm2838_vm8, %v2844_v15, %v2846_v10  ;;  %v2863_v49 = vsel %vm2838_vm8, %v2860_v14, %v2862_v48  ;;  %v2867_v15 = vsel %vm2838_vm8, %v2864_v62, %v2866_v34 }
 0x119   : > { %v1669_v46 = vor.u32 %v1668_v24, %v1667_v43  ;;  %v6460_v42 = vmul.u32.u64.low 3817748708, %v3230_v60  ;;  %v6461_v41 = vmul.u32.u64.high 3817748708, %v3230_v60, %v6460_v42 }
 0x11b   : > { %v1670_v28 = vsel %vm1597_vm3, %v1663_v16, %v1669_v46  ;;  %v1679_v2 = vsel %vm1597_vm3, %v1669_v46, %v1678_v7  ;;  %v3312_v40 = vshrl.u32 %v6461_v41, 4 }
 0x11d   : > { %4852 = vmatmul.mubr.msk.bf16.gmra.mrb[20].mxu1 %vm607_vm4, %v6203_v29  ;;  %v2849_v29 = vsel %vm2838_vm8, %v2846_v10, %v2848_v23  ;;  %v2871_v10 = vsel %vm2838_vm8, %v2868_v36, %v2870_v51  ;;  %v3313_v16 = vmul.u32 18, %v3312_v40  ;;  %v8087_v40 = vmov 0 }
 0x11e   : > { %4855 = vmatprep.mubr.msk.bf16.mxu1 %vm607_vm4, %v6219_v4  ;;  %v2850_v4 = vrot.slane %v5670_v5, 3  ;;  %v2854_v5 = vrot.slane %v5706_v35, 3 }
 0x11f   : > { %5022 = vmatmul.mubr.msk.bf16.vlgmr.msra.gmra.mrb[0].mxu0 %vm607_vm4, %v2843_v22  ;;  %v2869_v22 = vsel %vm2838_vm8, %v2866_v34, %v2868_v36 }
 0x120   : > { %5025 = vmatprep.mubr.msk.bf16.mxu0 %vm607_vm4, %v2845_v17  ;;  %v2855_v35 = vsel %vm2838_vm8, %v2852_v47, %v2854_v5  ;;  %v2872_v17 = vrot.slane %v5857_v8, 3  ;;  %v3228_v8 = vadd.s32 16, %v6433_v11 }
 0x125   : > { %4856 = vmatmul.mubr.msk.bf16.gmra.mrb[24].mxu1 %vm607_vm4, %v6222_v39  ;;  %v2851_v39 = vsel %vm2838_vm8, %v2848_v23, %v2850_v4  ;;  %v2873_v23 = vsel %vm2838_vm8, %v2870_v51, %v2872_v17 }
 0x126   : > { %4859 = vmatprep.mubr.msk.bf16.mxu1 %vm607_vm4, %v6235_v52  ;;  %v2853_v52 = vsel %vm2838_vm8, %v2850_v4, %v2852_v47  ;;  %v3229_v4 = vadd.s32 24, %v6433_v11  ;;  %v6441_v47 = vmul.u32.u64.low 3817748708, %v6433_v11  ;;  %v6442_v56 = vmul.u32.u64.high 3817748708, %v6433_v11, %v6441_v47 }
 0x127   : > { %5026 = vmatmul.mubr.msk.bf16.gmra.mrb[4].mxu0 %vm607_vm4, %v2847_v38  ;;  %v2874_v38 = vrot.slane %v8064_v55, 3  ;;  %v3227_v55 = vadd.s32 8, %v6433_v11 }
 0x128   : > { %5029 = vmatprep.mubr.msk.bf16.mxu0 %vm607_vm4, %v2849_v29  ;;  %v6436_v7 = vmul.u32.u64.low 3817748708, %v3228_v8  ;;  %v6437_v29 = vmul.u32.u64.high 3817748708, %v3228_v8, %v6436_v7 }
 0x129   : > { %v2875_v44 = vsel %vm2838_vm8, %v2872_v17, %v2874_v38 }
 0x12d   : > { %4860 = vmatmul.mubr.msk.bf16.gmra.mrb[28].mxu1 %vm607_vm4, %v6238_v18  ;;  %v2856_v18 = vrot.slane %v5738_v61, 3 }
 0x12e   : > { %4863 = vmatprep.mubr.msk.bf16.mxu1 %vm607_vm4, %v6254_v12  ;;  %v1646_v12 = vrot.slane %v8056_v57, 2 }
 0x12f   : > { %5030 = vmatmul.mubr.msk.bf16.gmra.mrb[8].mxu0 %vm607_vm4, %v2851_v39  ;;  %v2857_v63 = vsel %vm2838_vm8, %v2854_v5, %v2856_v18  ;;  %v2859_v20 = vsel %vm2838_vm8, %v2856_v18, %v2858_v58 }
 0x130   : > { %5033 = vmatprep.mubr.msk.bf16.mxu0 %vm607_vm4, %v2853_v52  ;;  %v1647_v61 = vor.u32 %v1646_v12, %v1645_v32  ;;  %v6446_v39 = vmul.u32.u64.low 3817748708, %v3229_v4  ;;  %v6447_v52 = vmul.u32.u64.high 3817748708, %v3229_v4, %v6446_v39  ;;  %v3231_v12 = vadd.s32 40, %v6433_v11 }
 0x131   : > { %v6454_v18 = vmul.u32.u64.low 3817748708, %v3232_v9  ;;  %v6455_v32 = vmul.u32.u64.high 3817748708, %v3232_v9, %v6454_v18 }
 0x132   : > { %v1648_v57 = vsel %vm1597_vm3, %v1643_v26, %v1647_v61  ;;  %v1652_v6 = vsel %vm1597_vm3, %v1647_v61, %v1651_v19  ;;  %v6450_v26 = vmul.u32.u64.low 3817748708, %v3227_v55  ;;  %v6451_v5 = vmul.u32.u64.high 3817748708, %v3227_v55, %v6450_v26 }
 0x133   : > { %v6467_v19 = vmul.u32.u64.low 3817748708, %v3231_v12  ;;  %v6468_v58 = vmul.u32.u64.high 3817748708, %v3231_v12, %v6467_v19  ;;  %v3301_v21 = vshrl.u32 %v6447_v52, 4  ;;  %v3334_v33 = vshrl.u32 %v6455_v32, 4 }
 0x134   : > { %v3279_v54 = vshrl.u32 %v6451_v5, 4  ;;  %v6585_v5 = vadd.s32 96, %v6433_v11  ;;  %v8076_v18 = vmov 0  ;;  %v8080_v19 = vmov 0 }
 0x135   : > { %4864 = vmatmul.mubr.msk.bf16.gmra.mrb[32].mxu1 %vm607_vm4, %v1375_v30  ;;  %v3233_v30 = vadd.s32 56, %v6433_v11  ;;  %v3302_v27 = vmul.u32 18, %v3301_v21  ;;  %v3335_v59 = vmul.u32 18, %v3334_v33  ;;  %v3323_v1 = vshrl.u32 %v6468_v58, 4 }
 0x136   : > { %4889 = vmatprep.mubr.msk.bf16.mxu1 %vm607_vm4, %v1644_v45  ;;  %v3290_v45 = vshrl.u32 %v6437_v29, 4 }
 0x137   : > { %5034 = vmatmul.mubr.msk.bf16.gmra.mrb[12].mxu0 %vm607_vm4, %v2855_v35  ;;  %v3268_v35 = vshrl.u32 %v6442_v56, 4  ;;  %v6506_v36 = vsub.s32 %v3232_v9, %v3335_v59 }
 0x138   : > { %5037 = vmatprep.mubr.msk.bf16.mxu0 %vm607_vm4, %v2857_v63  ;;  %v6464_v63 = vmul.u32.u64.low 3817748708, %v3233_v30  ;;  %v6465_v61 = vmul.u32.u64.high 3817748708, %v3233_v30, %v6464_v63  ;;  %v3291_v13 = vmul.u32 18, %v3290_v45  ;;  %v8078_v45 = vmov 0 }
 0x139   : > { %vm3664_vm2 = vcmp.ne.s32.totalorder %v6506_v36, 0  ;;  %v6598_v32 = vadd.s32 18, %v6506_v36  ;;  %v8098_v63 = vmov 0 }
 0x13a   : > { %v3345_v62 = vshrl.u32 %v6465_v61, 4 }
 0x13d   : > { %4890 = vmatmul.mubr.msk.bf16.vlgmr.msra.gmra.mrb[20].mxu1 %vm607_vm4, %v1648_v57  ;;  %v6470_v57 = vmul.u32.u64.low 3817748708, %v3236_v25  ;;  %v6471_v14 = vmul.u32.u64.high 3817748708, %v3236_v25, %v6470_v57 }
 0x13e   : > { %4893 = vmatprep.mubr.msk.bf16.mxu1 %vm607_vm4, %v1652_v6  ;;  %v3269_v6 = vmul.u32 18, %v3268_v35  ;;  %v6640_v57 = vadd.s32 120, %v6433_v11 }
 0x13f   : > { %5038 = vmatmul.mubr.msk.bf16.gmra.mrb[16].mxu0 %vm607_vm4, %v2859_v20  ;;  %v6477_v20 = vadd.s32 64, %v6433_v11  ;;  %v3378_v24 = vshrl.u32 %v6471_v14, 4  ;;  %v8082_v14 = vmov 0 }
 0x140   : > { %5041 = vmatprep.mubr.msk.bf16.mxu0 %vm607_vm4, %v2861_v31  ;;  %v6479_v31 = vsub.s32 %v3228_v8, %v3291_v13  ;;  %v6483_v48 = vsub.s32 %v6433_v11, %v3269_v6 }
 0x142   : > { %vm3660_vm9 = vcmp.ne.s32.totalorder %v6479_v31, 0  ;;  %vm3696_vm10 = vcmp.lt.s32.totalorder %v6479_v31, 0  ;;  %v6500_v46 = vadd.s32 18, %v6479_v31  ;;  %vm3658_vm11 = vcmp.ne.s32.totalorder %v6483_v48, 0 }
 0x143   : > { %vm3694_vm12 = vcmp.lt.s32.totalorder %v6483_v48, 0  ;;  %v6516_v17 = vadd.s32 18, %v6483_v48  ;;  %vm6535_vm0 = vmand %vm3696_vm10, %vm3660_vm9 }
 0x144   : > { %vm6548_vm3 = vmand %vm3694_vm12, %vm3658_vm11 }
 0x145   : > { %4894 = vmatmul.mubr.msk.bf16.gmra.mrb[24].mxu1 %vm607_vm4, %v1656_v37  ;;  %v3280_v37 = vmul.u32 18, %v3279_v54  ;;  %v6657_v6 = vmul.u32.u64.low 3817748708, %v6585_v5  ;;  %v6658_v54 = vmul.u32.u64.high 3817748708, %v6585_v5, %v6657_v6 }
 0x146   : > { %4897 = vmatprep.mubr.msk.bf16.mxu1 %vm607_vm4, %v1660_v3  ;;  %v6488_v3 = vmul.u32.u64.low 3817748708, %v6477_v20  ;;  %v6489_v43 = vmul.u32.u64.high 3817748708, %v6477_v20, %v6488_v3 }
 0x147   : > { %5042 = vmatmul.mubr.msk.bf16.gmra.mrb[20].mxu0 %vm607_vm4, %v2863_v49  ;;  %v6493_v49 = vadd.s32 88, %v6433_v11  ;;  %v6502_v34 = vsub.s32 %v3227_v55, %v3280_v37  ;;  %v8072_v55 = vmov 0  ;;  %v3400_v59 = vshrl.u32 %v6658_v54, 4 }
 0x148   : > { %5045 = vmatprep.mubr.msk.bf16.mxu0 %vm607_vm4, %v2865_v0  ;;  %v6496_v0 = vsub.s32 %v3229_v4, %v3302_v27  ;;  %v3356_v7 = vshrl.u32 %v6489_v43, 4 }
 0x149   : > { %vm3659_vm15 = vcmp.ne.s32.totalorder %v6502_v34, 0  ;;  %vm3695_vm1 = vcmp.lt.s32.totalorder %v6502_v34, 0  ;;  %v6580_v26 = vadd.s32 18, %v6502_v34 }
 0x14a   : > { %vm3661_vm13 = vcmp.ne.s32.totalorder %v6496_v0, 0  ;;  %vm3697_vm14 = vcmp.lt.s32.totalorder %v6496_v0, 0  ;;  %v6526_v38 = vadd.s32 18, %v6496_v0  ;;  %vm6575_vm8 = vmand %vm3695_vm1, %vm3659_vm15 }
 0x14b   : > { %vm6561_vm5 = vmand %vm3697_vm14, %vm3661_vm13 }
 0x14c   : > { %v8073_v55 = vsel %vm6561_vm5, 4294967295, %v8072_v55 }
 0x14d   : > { %4898 = vmatmul.mubr.msk.bf16.gmra.mrb[28].mxu1 %vm607_vm4, %v1664_v53  ;;  %v3346_v53 = vmul.u32 18, %v3345_v62  ;;  %v6680_v62 = vadd.s32 104, %v6433_v11 }
 0x14e   : > { %4901 = vmatprep.mubr.msk.bf16.mxu1 %vm607_vm4, %v1670_v28  ;;  %v3324_v28 = vmul.u32 18, %v3323_v1  ;;  %v6742_v1 = vadd.s32 176, %v6433_v11 }
 0x14f   : > { %5046 = vmatmul.mubr.msk.bf16.gmra.mrb[24].mxu0 %vm607_vm4, %v2867_v15  ;;  %v3379_v15 = vmul.u32 18, %v3378_v24 }
 0x150   : > { %5049 = vmatprep.mubr.msk.bf16.mxu0 %vm607_vm4, %v2869_v22  ;;  %v6509_v22 = vmul.u32.u64.low 3817748708, %v6493_v49  ;;  %v6510_v51 = vmul.u32.u64.high 3817748708, %v6493_v49, %v6509_v22  ;;  %v6541_v8 = vsub.s32 %v3231_v12, %v3324_v28  ;;  %v3357_v12 = vmul.u32 18, %v3356_v7 }
 0x151   : > { %v6553_v4 = vsub.s32 %v3236_v25, %v3379_v15  ;;  %v6714_v7 = vadd.s32 128, %v6433_v11 }
 0x152   : > { %8068 = vst [vmem:[#allocation3_spill] sm:$0xff] %v6541_v8  ;;  %vm3663_vm12 = vcmp.ne.s32.totalorder %v6541_v8, 0  ;;  %vm3699_vm13 = vcmp.lt.s32.totalorder %v6541_v8, 0  ;;  %v3389_v41 = vshrl.u32 %v6510_v51, 4  ;;  %v6651_v13 = vadd.s32 18, %v6541_v8 }
 0x153   : > { %8071 = vst [vmem:[#allocation2_spill] sm:$0xff] %v6553_v4  ;;  %vm3668_vm15 = vcmp.ne.s32.totalorder %v6553_v4, 0  ;;  %vm3704_vm1 = vcmp.lt.s32.totalorder %v6553_v4, 0  ;;  %v6654_v21 = vadd.s32 18, %v6553_v4  ;;  %v6677_v37 = vsub.s32 %v6477_v20, %v3357_v12 }
 0x154   : > { %8085 = vst [vmem:[#allocation5_spill] sm:$0xff] %v6651_v13  ;;  %v3390_v3 = vmul.u32 18, %v3389_v41  ;;  %v6856_v8 = vadd.s32 192, %v6433_v11 }
 0x155   : > { %4902 = vmatmul.mubr.msk.bf16.gmra.mrb[32].mxu1 %vm607_vm4, %v1679_v2  ;;  %v6513_v2 = vadd.s32 72, %v6433_v11  ;;  %8086 = vst [vmem:[#allocation9_spill] sm:$0xff] %v6654_v21  ;;  %8090 = vst [vmem:[#allocation10_spill] sm:$0xff] %v6677_v37  ;;  %v3401_v21 = vmul.u32 18, %v3400_v59 }
 0x156   : > { %v6730_v41 = vsub.s32 %v6493_v49, %v3390_v3  ;;  %v6746_v27 = vmul.u32.u64.low 3817748708, %v6714_v7  ;;  %v6747_v49 = vmul.u32.u64.high 3817748708, %v6714_v7, %v6746_v27  ;;  %v6750_v3 = vadd.s32 160, %v6433_v11 }
 0x157   : > { %5050 = vmatmul.mubr.msk.bf16.gmra.mrb[28].mxu0 %vm607_vm4, %v2871_v10  ;;  %v6519_v10 = vsub.s32 %v3230_v60, %v3313_v16  ;;  %v6556_v47 = vmul.u32.u64.low 3817748708, %v6513_v2  ;;  %v6557_v56 = vmul.u32.u64.high 3817748708, %v6513_v2, %v6556_v47  ;;  %v8074_v60 = vmov 0 }
 0x158   : > { %5053 = vmatprep.mubr.msk.bf16.mxu0 %vm607_vm4, %v2873_v23  ;;  %v6522_v23 = vadd.s32 112, %v6433_v11  ;;  %v8075_v60 = vsel %vm6575_vm8, 4294967295, %v8074_v60  ;;  %v6693_v20 = vmul.u32.u64.low 3817748708, %v6640_v57  ;;  %v6694_v16 = vmul.u32.u64.high 3817748708, %v6640_v57, %v6693_v20  ;;  %8094 = vst [vmem:[#allocation14_spill] sm:$0xff] %v6730_v41 }
 0x159   : > { %vm3662_vm6 = vcmp.ne.s32.totalorder %v6519_v10, 0  ;;  %vm3698_vm7 = vcmp.lt.s32.totalorder %v6519_v10, 0  ;;  %v6613_v42 = vadd.s32 18, %v6519_v10  ;;  %v3367_v43 = vshrl.u32 %v6557_v56, 4 }
 0x15a   : > { %v6568_v9 = vmul.u32.u64.low 3817748708, %v6522_v23  ;;  %v6569_v39 = vmul.u32.u64.high 3817748708, %v6522_v23, %v6568_v9  ;;  %vm6608_vm14 = vmand %vm3698_vm7, %vm3662_vm6  ;;  %vm3666_vm7 = vcmp.ne.s32.totalorder %v6677_v37, 0  ;;  %v6733_v20 = vadd.s32 136, %v6433_v11 }
 0x15b   : > { %v8079_v45 = vsel %vm6608_vm14, 4294967295, %v8078_v45  ;;  %vm6672_vm6 = vmand %vm3704_vm1, %vm3668_vm15  ;;  %v6720_v56 = vmul.u32.u64.low 3817748708, %v6680_v62  ;;  %v6721_v9 = vmul.u32.u64.high 3817748708, %v6680_v62, %v6720_v56  ;;  %v3368_v6 = vmul.u32 18, %v3367_v43 }
 0x15c   : > { %v8088_v40 = vsel %vm6672_vm6, 4294967295, %v8087_v40  ;;  %v3422_v24 = vshrl.u32 %v6569_v39, 4  ;;  %v6724_v39 = vadd.s32 152, %v6433_v11  ;;  %v6753_v43 = vadd.s32 18, %v6677_v37 }
 0x15d   : > { %8089 = vst [vmem:[#allocation7_spill] sm:$0xff] %v8088_v40  ;;  %v6764_v54 = vsub.s32 %v6513_v2, %v3368_v6  ;;  %v6767_v27 = vmul.u32.u64.low 3817748708, %v6733_v20  ;;  %v6768_v61 = vmul.u32.u64.high 3817748708, %v6733_v20, %v6767_v27 }
 0x15e   : > { %v3423_v22 = vmul.u32 18, %v3422_v24  ;;  %8096 = vst [vmem:[#allocation15_spill] sm:$0xff] %v6753_v43  ;;  %v6756_v24 = vmul.u32.u64.low 3817748708, %v6724_v39  ;;  %v6757_v33 = vmul.u32.u64.high 3817748708, %v6724_v39, %v6756_v24 }
 0x15f   : > { %5054 = vmatmul.mubr.msk.bf16.gmra.mrb[32].mxu0 %vm607_vm4, %v2875_v44  ;;  %v6529_v44 = vsub.s32 %v3233_v30, %v3346_v53  ;;  %vm3700_vm4 = vcmp.lt.s32.totalorder %v6506_v36, 0  ;;  %v6697_v53 = vadd.s32 144, %v6433_v11  ;;  %8097 = vst [vmem:[#allocation16_spill] sm:$0xff] %v6764_v54  ;;  %v3433_v24 = vshrl.u32 %v6694_v16, 4 }
 0x160   : > { %vm6593_vm11 = vmand %vm3700_vm4, %vm3664_vm2  ;;  %v6781_v4 = vmul.u32.u64.low 3817748708, %v6742_v1  ;;  %v6782_v2 = vmul.u32.u64.high 3817748708, %v6742_v1, %v6781_v4  ;;  %v6787_v27 = vsub.s32 %v6522_v23, %v3423_v22  ;;  %vm3667_vm15 = vcmp.ne.s32.totalorder %v6764_v54, 0 }
 0x161   : > { %vm3665_vm9 = vcmp.ne.s32.totalorder %v6529_v44, 0  ;;  %vm3701_vm10 = vcmp.lt.s32.totalorder %v6529_v44, 0  ;;  %v8077_v18 = vsel %vm6593_vm11, 4294967295, %v8076_v18  ;;  %v6637_v58 = vadd.s32 18, %v6529_v44  ;;  %vm6646_vm4 = vmand %vm3699_vm13, %vm3663_vm12 }
 0x162   : > { %vm6632_vm2 = vmand %vm3701_vm10, %vm3665_vm9  ;;  %v8083_v14 = vsel %vm6646_vm4, 4294967295, %v8082_v14  ;;  %vm3702_vm9 = vcmp.lt.s32.totalorder %v6677_v37, 0  ;;  %v6738_v15 = vmul.u32.u64.low 3817748708, %v6697_v53  ;;  %v6739_v56 = vmul.u32.u64.high 3817748708, %v6697_v53, %v6738_v15  ;;  %8102 = vst [vmem:[#allocation18_spill] sm:$0xff] %v6787_v27 }
 0x163   : > { %v8081_v19 = vsel %vm6632_vm2, 4294967295, %v8080_v19  ;;  %8084 = vst [vmem:[#allocation6_spill] sm:$0xff] %v8083_v14  ;;  %v6760_v15 = vadd.s32 184, %v6433_v11  ;;  %vm3669_vm10 = vcmp.ne.s32.totalorder %v6730_v41, 0  ;;  %vm6774_vm12 = vmand %vm3702_vm9, %vm3666_vm7  ;;  %vm3705_vm13 = vcmp.lt.s32.totalorder %v6730_v41, 0 }
 0x164   : > { %v8099_v63 = vsel %vm6774_vm12, 4294967295, %v8098_v63  ;;  %v6801_v4 = vadd.s32 168, %v6433_v11  ;;  %v6817_v22 = vadd.s32 18, %v6730_v41  ;;  %vm6827_vm7 = vmand %vm3705_vm13, %vm3669_vm10  ;;  %v8107_v23 = vmov 0 }
 0x165   : > { %8100 = vst [vmem:[#allocation4_spill] sm:$0xff] %v8099_v63  ;;  %v8108_v23 = vsel %vm6827_vm7, 4294967295, %v8107_v23  ;;  %vm3672_vm9 = vcmp.ne.s32.totalorder %v6787_v27, 0  ;;  %vm3708_vm1 = vcmp.lt.s32.totalorder %v6787_v27, 0  ;;  %vm8110_vm12 = vcmp.lt.s32.totalorder %v6764_v54, 0 }
 0x166   : > { %vm6841_vm6 = vmand %vm8110_vm12, %vm3667_vm15  ;;  %v3477_v37 = vshrl.u32 %v6757_v33, 4  ;;  %v6847_v43 = vmul.u32.u64.low 3817748708, %v6801_v4  ;;  %v6848_v63 = vmul.u32.u64.high 3817748708, %v6801_v4, %v6847_v43  ;;  %v6863_v33 = vadd.s32 18, %v6787_v27 }
 0x167   : > { %v3510_v43 = vshrl.u32 %v6782_v2, 4  ;;  %vm6876_vm10 = vmand %vm3708_vm1, %vm3672_vm9 }
 0x1c8   : > { %v6571_v52 = vpop.f32.mrb[0].mxu1 }
 0x1c9   : > { %v6587_v30 = vpop.f32.mrb[1].mxu1 }
 0x1ca   : > { %v6602_v25 = vpop.f32.mrb[2].mxu1 }
 0x1cb   : > { %v6618_v35 = vpop.f32.mrb[3].mxu1 }
 0x1d0   : > { %v6699_v28 = vpop.f32.mrb[4].mxu1 }
 0x1d1   : > { %8091 = vst [vmem:[#allocation8_spill] sm:$0xff] %v6699_v28  ;;  %v6716_v47 = vpop.f32.mrb[5].mxu1  ;;  %v6797_v16 = vmul.u32.u64.low 3817748708, %v6760_v15  ;;  %v6798_v28 = vmul.u32.u64.high 3817748708, %v6760_v15, %v6797_v16 }
 0x1d2   : > { %8092 = vst [vmem:[#allocation13_spill] sm:$0xff] %v6716_v47  ;;  %v6726_v12 = vpop.f32.mrb[6].mxu1  ;;  %v3411_v47 = vshrl.u32 %v6721_v9, 4  ;;  %v6820_v9 = vadd.s32 18, %v6764_v54  ;;  %v3434_v16 = vmul.u32 18, %v3433_v24 }
 0x1d3   : > { %8093 = vst [vmem:[#allocation11_spill] sm:$0xff] %v6726_v12  ;;  %v6735_v51 = vpop.f32.mrb[7].mxu1  ;;  %v3521_v54 = vshrl.u32 %v6798_v28, 4 }
 0x1d4   : > { %8095 = vst [vmem:[#allocation12_spill] sm:$0xff] %v6735_v51  ;;  %v6790_v40 = vmul.u32.u64.low 3817748708, %v6750_v3  ;;  %v6791_v51 = vmul.u32.u64.high 3817748708, %v6750_v3, %v6790_v40  ;;  %8106 = vst [vmem:[#allocation22_spill] sm:$0xff] %v6820_v9  ;;  %v3412_v24 = vmul.u32 18, %v3411_v47  ;;  %v6881_v47 = vsub.s32 %v6640_v57, %v3434_v16 }
 0x1d5   : > { %v6812_v40 = vadd.s32 208, %v6433_v11 }
 0x1d6   : > { %v3488_v2 = vshrl.u32 %v6791_v51, 4  ;;  %v6922_v16 = vadd.s32 18, %v6881_v47 }
 0x1d8   : > { %v6784_v6 = vpop.f32.mrb[8].mxu1 }
 0x1d9   : > { %8101 = vst [vmem:[#allocation17_spill] sm:$0xff] %v6784_v6  ;;  %v6793_v12 = vpop.f32.mrb[9].mxu1 }
 0x1da   : > { %8103 = vst [vmem:[#allocation19_spill] sm:$0xff] %v6793_v12  ;;  %v6803_v6 = vpop.f32.mrb[10].mxu1  ;;  %v3444_v12 = vshrl.u32 %v6747_v49, 4 }
 0x1db   : > { %8104 = vst [vmem:[#allocation20_spill] sm:$0xff] %v6803_v6  ;;  %v6814_v59 = vpop.f32.mrb[11].mxu1  ;;  %v3466_v6 = vshrl.u32 %v6739_v56, 4  ;;  %v8111_v56 = vmov 0 }
 0x1dc   : > { %8105 = vst [vmem:[#allocation21_spill] sm:$0xff] %v6814_v59  ;;  %v6834_v59 = vsub.s32 %v6585_v5, %v3401_v21  ;;  %v8112_v56 = vsel %vm6841_vm6, 4294967295, %v8111_v56  ;;  %v3455_v5 = vshrl.u32 %v6768_v61, 4  ;;  %v3478_v61 = vmul.u32 18, %v3477_v37 }
 0x1dd   : > { %8113 = vst [vmem:[#allocation24_spill] sm:$0xff] %v8112_v56  ;;  %v6852_v21 = vmul.u32.u64.low 3817748708, %v6812_v40  ;;  %v6853_v49 = vmul.u32.u64.high 3817748708, %v6812_v40, %v6852_v21  ;;  %v3467_v13 = vmul.u32 18, %v3466_v6  ;;  %v6892_v56 = vsub.s32 %v6680_v62, %v3412_v24 }
 0x1de   : > { %8109 = vst [vmem:[#allocation23_spill] sm:$0xff] %v6834_v59  ;;  %v8115_v21 = vmov 0  ;;  %v3445_v6 = vmul.u32 18, %v3444_v12  ;;  %vm3670_vm12 = vcmp.ne.s32.totalorder %v6834_v59, 0  ;;  %vm3706_vm13 = vcmp.lt.s32.totalorder %v6834_v59, 0 }
 0x1df   : > { %v8116_v21 = vsel %vm6876_vm10, 4294967295, %v8115_v21  ;;  %v3456_v41 = vmul.u32 18, %v3455_v5  ;;  %v6895_v57 = vmul.u32.u64.low 3817748708, %v6856_v8  ;;  %v6896_v12 = vmul.u32.u64.high 3817748708, %v6856_v8, %v6895_v57  ;;  %vm6912_vm15 = vmand %vm3706_vm13, %vm3670_vm12 }
 0x1e0   : > { %v6866_v14 = vpop.f32.mrb[12].mxu1  ;;  %v6905_v37 = vadd.s32 18, %v6834_v59  ;;  %v6908_v28 = vsub.s32 %v6697_v53, %v3467_v13  ;;  %v3511_v62 = vmul.u32 18, %v3510_v43  ;;  %v8121_v24 = vmov 0 }
 0x1e1   : > { %8114 = vst [vmem:[#allocation25_spill] sm:$0xff] %v6866_v14  ;;  %v6884_v14 = vpop.f32.mrb[13].mxu1  ;;  %v8122_v24 = vsel %vm6912_vm15, 4294967295, %v8121_v24  ;;  %v6919_v5 = vsub.s32 %v6714_v7, %v3445_v6  ;;  %v3489_v57 = vmul.u32 18, %v3488_v2  ;;  %v6925_v13 = vsub.s32 %v6724_v39, %v3478_v61 }
 0x1e2   : > { %8117 = vst [vmem:[#allocation26_spill] sm:$0xff] %v6884_v14  ;;  %v6889_v9 = vpop.f32.mrb[14].mxu1  ;;  %8120 = vst [vmem:[#allocation29_spill] sm:$0xff] %v6905_v37  ;;  %v3522_v53 = vmul.u32 18, %v3521_v54  ;;  %v3499_v43 = vshrl.u32 %v6848_v63, 4  ;;  %v3554_v7 = vshrl.u32 %v6853_v49, 4  ;;  %v6941_v63 = vsub.s32 %v6742_v1, %v3511_v62 }
 0x1e3   : > { %8118 = vst [vmem:[#allocation27_spill] sm:$0xff] %v6889_v9  ;;  %v6898_v51 = vpop.f32.mrb[15].mxu1  ;;  %8123 = vst [vmem:[#allocation30_spill] sm:$0xff] %v8122_v24  ;;  %vm8126_vm13 = vcmp.ne.s32.totalorder %v6881_v47, 0  ;;  %vm8127_vm12 = vcmp.lt.s32.totalorder %v6881_v47, 0  ;;  %v6959_v1 = vsub.s32 %v6750_v3, %v3489_v57  ;;  %vm8132_vm15 = vcmp.ne.s32.totalorder %v6892_v56, 0 }
 0x1e4   : > { %8119 = vst [vmem:[#allocation28_spill] sm:$0xff] %v6898_v51  ;;  %v6931_v51 = vsub.s32 %v6733_v20, %v3456_v41  ;;  %8124 = vst [vmem:[#allocation31_spill] sm:$0xff] %v6941_v63  ;;  %v6954_v20 = vadd.s32 18, %v6892_v56  ;;  %vm8133_vm6 = vcmp.lt.s32.totalorder %v6892_v56, 0  ;;  %v6974_v61 = vsub.s32 %v6760_v15, %v3522_v53 }
 0x1e5   : > { %vm6949_vm10 = vmand %vm8127_vm12, %vm8126_vm13  ;;  %8130 = vst [vmem:[#allocation33_spill] sm:$0xff] %v6959_v1  ;;  %v3500_v2 = vmul.u32 18, %v3499_v43  ;;  %vm8138_vm1 = vcmp.ne.s32.totalorder %v6908_v28, 0  ;;  %vm8139_vm9 = vcmp.lt.s32.totalorder %v6908_v28, 0  ;;  %v3555_v57 = vmul.u32 18, %v3554_v7 }
 0x1e6   : > { %vm6967_vm12 = vmand %vm8133_vm6, %vm8132_vm15  ;;  %8136 = vst [vmem:[#allocation35_spill] sm:$0xff] %v6974_v61  ;;  %vm3711_vm15 = vcmp.lt.s32.totalorder %v6931_v51, 0  ;;  %v3532_v6 = vshrl.u32 %v6896_v12, 4  ;;  %v6992_v53 = vadd.s32 18, %v6908_v28  ;;  %vm8143_vm7 = vcmp.ne.s32.totalorder %v6919_v5, 0 }
 0x1e7   : > { %vm6982_vm4 = vmand %vm8139_vm9, %vm8138_vm1  ;;  %vm8144_vm13 = vcmp.lt.s32.totalorder %v6919_v5, 0  ;;  %vm3680_vm9 = vcmp.ne.s32.totalorder %v6941_v63, 0  ;;  %vm3716_vm6 = vcmp.lt.s32.totalorder %v6941_v63, 0  ;;  %vm8147_vm2 = vcmp.ne.s32.totalorder %v6925_v13, 0 }
 0x1e8   : > { %v6943_v39 = vpop.f32.mrb[16].mxu1  ;;  %vm6998_vm1 = vmand %vm8144_vm13, %vm8143_vm7  ;;  %vm8148_vm14 = vcmp.lt.s32.totalorder %v6925_v13, 0  ;;  %v8149_v12 = vmov 0  ;;  %v7016_v7 = vadd.s32 18, %v6925_v13  ;;  %vm3678_vm7 = vcmp.ne.s32.totalorder %v6959_v1, 0 }
 0x1e9   : > { %8125 = vst [vmem:[#allocation32_spill] sm:$0xff] %v6943_v39  ;;  %v6961_v54 = vpop.f32.mrb[17].mxu1  ;;  %vm7011_vm11 = vmand %vm8148_vm14, %vm8147_vm2  ;;  %vm8151_vm8 = vcmp.ne.s32.totalorder %v6931_v51, 0  ;;  %v7030_v39 = vadd.s32 18, %v6931_v51  ;;  %vm3681_vm14 = vcmp.ne.s32.totalorder %v6974_v61, 0  ;;  %vm3717_vm2 = vcmp.lt.s32.totalorder %v6974_v61, 0 }
 0x1ea   : > { %8131 = vst [vmem:[#allocation34_spill] sm:$0xff] %v6961_v54  ;;  %v6976_v3 = vpop.f32.mrb[18].mxu1  ;;  %v8150_v12 = vsel %vm7011_vm11, 4294967295, %v8149_v12  ;;  %vm7025_vm5 = vmand %vm3711_vm15, %vm8151_vm8  ;;  %v8152_v54 = vmov 0  ;;  %v7035_v9 = vsub.s32 %v6801_v4, %v3500_v2  ;;  %v8154_v59 = vmov 0 }
 0x1eb   : > { %8137 = vst [vmem:[#allocation36_spill] sm:$0xff] %v6976_v3  ;;  %v6989_v15 = vpop.f32.mrb[19].mxu1  ;;  %v7003_v3 = vadd.s32 18, %v6919_v5  ;;  %v8153_v54 = vsel %vm7025_vm5, 4294967295, %v8152_v54  ;;  %vm7041_vm13 = vmand %vm3716_vm6, %vm3680_vm9  ;;  %v7046_v37 = vadd.s32 18, %v6941_v63  ;;  %v7049_v24 = vsub.s32 %v6812_v40, %v3555_v57 }
 0x1ec   : > { %8142 = vst [vmem:[#allocation37_spill] sm:$0xff] %v6989_v15  ;;  %v7021_v15 = vadd.s32 216, %v6433_v11  ;;  %v8155_v59 = vsel %vm7041_vm13, 4294967295, %v8154_v59  ;;  %v3533_v27 = vmul.u32 18, %v3532_v6  ;;  %v8159_v4 = vsel %vm6535_vm0, %v6500_v46, %v6479_v31  ;;  %vm7103_vm9 = vmand %vm3717_vm2, %vm3681_vm14 }
 0x1ed   : > { %8156 = vst [vmem:[#allocation38_spill] sm:$0xff] %v8155_v59  ;;  %8157 = vst [vmem:[#allocation39_spill] sm:$0xff] %v7046_v37  ;;  %vm7056_vm8 = vcmp.lt.s32.totalorder %v8159_v4, 16  ;;  %vm8162_vm6 = vcmp.lt.s32.totalorder %v6959_v1, 0  ;;  %v8163_v31 = vmov 0  ;;  %v7077_v46 = vadd.s32 18, %v6959_v1 }
 0x1ee   : > { %8158 = vst [vmem:[#allocation40_spill] sm:$0xff] %v7049_v24  ;;  %vm7072_vm15 = vmand %vm8162_vm6, %vm3678_vm7  ;;  %v7080_v50 = vadd.s32 18, %v6974_v61  ;;  %v8168_v6 = vsel %vm6548_vm3, %v6516_v17, %v6483_v48  ;;  %v8171_v48 = vmov 0  ;;  %vm8174_vm3 = vnez %v8073_v55 }
 0x1ef   : > { %v8164_v31 = vsel %vm7072_vm15, 4294967295, %v8163_v31  ;;  %8166 = vst [vmem:[#allocation42_spill] sm:$0xff] %v7077_v46  ;;  %vm7087_vm0 = vcmp.lt.s32.totalorder %v8168_v6, 16  ;;  %v8172_v48 = vsel %vm7103_vm9, 4294967295, %v8171_v48  ;;  %v8175_v6 = vsel %vm8174_vm3, %v6526_v38, %v6496_v0 }
 0x1f0   : > { %8165 = vst [vmem:[#allocation41_spill] sm:$0xff] %v8164_v31  ;;  %8167 = vst [vmem:[#allocation43_spill] sm:$0xff] %v7080_v50  ;;  %v7108_v17 = vmul.u32.u64.low 3817748708, %v7021_v15  ;;  %v7109_v29 = vmul.u32.u64.high 3817748708, %v7021_v15, %v7108_v17  ;;  %vm7116_vm7 = vcmp.lt.s32.totalorder %v8175_v6, 16  ;;  %vm8178_vm11 = vnez %v8075_v60 }
 0x1f1   : > { %8173 = vst [vmem:[#allocation44_spill] sm:$0xff] %v8172_v48  ;;  %v7127_v17 = vadd.s32 200, %v6433_v11  ;;  %v8179_v0 = vsel %vm8178_vm11, %v6580_v26, %v6502_v34  ;;  %vm3684_vm2 = vcmp.ne.s32.totalorder %v7049_v24, 0  ;;  %v7145_v6 = vsub.s32 %v6856_v8, %v3533_v27  ;;  %v7150_v34 = vld [vmem:[%s7957_s3] ss:$0 sm:$0xff] }
 0x1f2   : > { %vm7134_vm3 = vcmp.lt.s32.totalorder %v8179_v0, 16  ;;  %v5023_v60 = vpop.f32.mrb[0].mxu0  ;;  %v7161_v8 = vadd.s32 18, %v7035_v9  ;;  %v7164_v27 = vadd.s32 240, %v6433_v11  ;;  %vm8183_vm11 = vcmp.ne.s32.totalorder %v7035_v9, 0 }
 0x1f3   : > { %8182 = vst [vmem:[#allocation45_spill] sm:$0xff] %v7145_v6  ;;  %v5059_v55 = vadd.f32 %v5023_v60, %v6571_v52  ;;  %v2967_v40 = vpop.f32.mrb[1].mxu0  ;;  %vm8184_vm6 = vcmp.lt.s32.totalorder %v7035_v9, 0  ;;  %v8185_v26 = vmov 0  ;;  %v7176_v14 = vadd.s32 18, %v7049_v24 }
 0x1f4   : > { %vm7171_vm14 = vmand %vm8184_vm6, %vm8183_vm11  ;;  %v7179_v0 = vadd.s32 224, %v6433_v11  ;;  %v7182_v61 = vadd.s32 248, %v6433_v11  ;;  %v5060_v52 = vadd.f32 %v2967_v40, %v6587_v30  ;;  %v5024_v60 = vpop.f32.mrb[2].mxu0  ;;  %vm8187_vm9 = vcmp.lt.s32.totalorder %v7049_v24, 0 }
 0x1f5   : > { %v8186_v26 = vsel %vm7171_vm14, 4294967295, %v8185_v26  ;;  %vm7189_vm6 = vmand %vm8187_vm9, %vm3684_vm2  ;;  %v7194_v48 = vmul.u32.u64.low 3817748708, %v7127_v17  ;;  %v7195_v1 = vmul.u32.u64.high 3817748708, %v7127_v17, %v7194_v48  ;;  %v7198_v46 = vadd.s32 232, %v6433_v11  ;;  %v2970_v40 = vpop.f32.mrb[3].mxu0 }
 0x1f6   : > { %v3155_v31 = vadd.f32 %v5059_v55, %v7150_v34  ;;  %v5061_v30 = vadd.f32 %v5024_v60, %v6602_v25  ;;  %vm3718_vm9 = vcmp.lt.s32.totalorder %v7145_v6, 0  ;;  %v3153_v63 = vadd.f32 %v5060_v52, %v7150_v34 }
 0x1f7   : > { %v5062_v37 = vadd.f32 %v2970_v40, %v6618_v35  ;;  %vm8190_vm2 = vnez %v8077_v18  ;;  %v7221_v55 = vadd.s32 18, %v7145_v6  ;;  %vm8194_vm11 = vnez %v8079_v45 }
 0x1f8   : > { %v8191_v48 = vsel %vm8190_vm2, %v6598_v32, %v6506_v36  ;;  %v3191_v52 = vmax.f32 %v3155_v31, 0.0  ;;  %v3156_v35 = vadd.f32 %v5061_v30, %v7150_v34  ;;  %v8195_v36 = vsel %vm8194_vm11, %v6613_v42, %v6519_v10  ;;  %v8209_v30 = vld [vmem:[#allocation3_spill] sm:$0xff] }
 0x1f9   : > { %vm7212_vm15 = vcmp.lt.s32.totalorder %v8191_v48, 16  ;;  %vm7229_vm2 = vcmp.lt.s32.totalorder %v8195_v36, 16  ;;  %v3565_v60 = vshrl.u32 %v7109_v29, 4  ;;  %v3189_v40 = vmax.f32 %v3153_v63, 0.0 }
 0x1fa   : > { %v3154_v31 = vadd.f32 %v5062_v37, %v7150_v34  ;;  %vm8198_vm14 = vnez %v8081_v19  ;;  %vm8202_vm13 = vcmp.ne.s32.totalorder %v7145_v6, 0  ;;  %v8203_v42 = vmov 0  ;;  %v8208_v37 = vld [vmem:[#allocation5_spill] sm:$0xff] }
 0x1fb   : > { %v8199_v45 = vsel %vm8198_vm14, %v6637_v58, %v6529_v44  ;;  %vm7250_vm5 = vmand %vm3718_vm9, %vm8202_vm13  ;;  %v7255_v29 = vmul.u32.u64.low 3817748708, %v7164_v27  ;;  %v7256_v63 = vmul.u32.u64.high 3817748708, %v7164_v27, %v7255_v29  ;;  %v3948_v44 = vsel %vm7056_vm8, %v3191_v52, 0.0  ;;  %v8206_v58 = vld [vmem:[#allocation6_spill] sm:$0xff] }
 0x1fc   : > { %vm7244_vm11 = vcmp.lt.s32.totalorder %v8199_v45, 16  ;;  %v8204_v42 = vsel %vm7250_vm5, 4294967295, %v8203_v42  ;;  %v3192_v19 = vmax.f32 %v3156_v35, 0.0  ;;  %vm8207_vm14 = vnez %v8206_v58  ;;  %v5027_v35 = vpop.f32.mrb[4].mxu0 }
 0x1fd   : > { %8205 = vst [vmem:[#allocation46_spill] sm:$0xff] %v8204_v42  ;;  %v8210_v48 = vsel %vm8207_vm14, %v8208_v37, %v8209_v30  ;;  %v7275_v45 = vmul.u32.u64.low 3817748708, %v7179_v0  ;;  %v7276_v29 = vmul.u32.u64.high 3817748708, %v7179_v0, %v7275_v45  ;;  %v4510_v32 = vpack.c.bf16 %v3948_v44, %v3948_v44  ;;  %v8214_v30 = vld [vmem:[#allocation8_spill] sm:$0xff]  ;;  %v2983_v24 = vpop.f32.mrb[5].mxu0  ;;  %v8216_v44 = vld [vmem:[#allocation13_spill] sm:$0xff] }
 0x1fe   : > { %vm7270_vm13 = vcmp.lt.s32.totalorder %v8210_v48, 16  ;;  %v3946_v2 = vsel %vm7087_vm0, %v3189_v40, 0.0  ;;  %v3190_v52 = vmax.f32 %v3154_v31, 0.0  ;;  %v7281_v58 = vadd.s32 272, %v6433_v11  ;;  %v5028_v4 = vpop.f32.mrb[6].mxu0 }
 0x1ff   : > { %v4508_v25 = vpack.c.bf16 %v3946_v2, %v3946_v2  ;;  %v3949_v37 = vsel %vm7116_vm7, %v3192_v19, 0.0  ;;  %v5063_v48 = vadd.f32 %v5027_v35, %v8214_v30  ;;  %vm8215_vm8 = vcmask 519168   ;;  %v8218_v30 = vld [vmem:[#allocation11_spill] sm:$0xff]  ;;  %v2986_v57 = vpop.f32.mrb[7].mxu0 }
 0x200   : > { %8213 = vst [vmem:[#allocation6_spill] sm:$0xff] %v7281_v58  ;;  %4129 = vst.msk [vmem:[%s7261_s27 + $0x8] sm:$0xf] %vm8215_vm8, %v4510_v32  ;;  %v4511_v40 = vpack.c.bf16 %v3949_v37, %v3949_v37  ;;  %v3947_v31 = vsel %vm7134_vm3, %v3190_v52, 0.0  ;;  %v5064_v45 = vadd.f32 %v2983_v24, %v8216_v44  ;;  %v3543_v19 = vshrl.u32 %v7195_v1, 4  ;;  %v8220_v32 = vld [vmem:[#allocation12_spill] sm:$0xff] }
 0x201   : > { %vm8217_vm0 = vmmov %vm8215_vm8  ;;  %v4509_v2 = vpack.c.bf16 %v3947_v31, %v3947_v31  ;;  %v3159_v35 = vadd.f32 %v5063_v48, %v7150_v34  ;;  %v5065_v42 = vadd.f32 %v5028_v4, %v8218_v30  ;;  %v3566_v6 = vmul.u32 18, %v3565_v60  ;;  %v8221_v37 = vld [vmem:[#allocation7_spill] sm:$0xff]  ;;  %v8223_v24 = vld [vmem:[#allocation9_spill] sm:$0xff] }
 0x202   : > { %4127 = vst.msk [vmem:[%s7261_s27] sm:$0xf] %vm8217_vm0, %v4508_v25  ;;  %vm8219_vm7 = vmmov %vm8217_vm0  ;;  %v3157_v38 = vadd.f32 %v5064_v45, %v7150_v34  ;;  %v5066_v52 = vadd.f32 %v2986_v57, %v8220_v32  ;;  %vm8222_vm3 = vnez %v8221_v37  ;;  %v8224_v44 = vld [vmem:[#allocation2_spill] sm:$0xff]  ;;  %v8229_v45 = vld [vmem:[#allocation4_spill] sm:$0xff]  ;;  %v8271_v41 = vsel %vm6967_vm12, %v6954_v20, %v6892_v56 }
 0x203   : > { %4130 = vst.msk [vmem:[%s7261_s27 + $0xc] sm:$0xf] %vm8219_vm7, %v4511_v40  ;;  %v8225_v1 = vsel %vm8222_vm3, %v8223_v24, %v8224_v44  ;;  %v7314_v48 = vmul.u32.u64.low 3817748708, %v7182_v61  ;;  %v7315_v31 = vmul.u32.u64.high 3817748708, %v7182_v61, %v7314_v48  ;;  %vm8228_vm14 = vmmov %vm8217_vm0  ;;  %v3195_v60 = vmax.f32 %v3159_v35, 0.0  ;;  %v8231_v57 = vld [vmem:[#allocation15_spill] sm:$0xff] }
 0x204   : > { %vm7309_vm9 = vcmp.lt.s32.totalorder %v8225_v1, 16  ;;  %4128 = vst.msk [vmem:[%s7261_s27 + $0x4] sm:$0xf] %vm8228_vm14, %v4509_v2  ;;  %v3160_v40 = vadd.f32 %v5065_v42, %v7150_v34  ;;  %vm8230_vm8 = vnez %v8229_v45  ;;  %v8232_v4 = vld [vmem:[#allocation10_spill] sm:$0xff]  ;;  %v3193_v44 = vmax.f32 %v3157_v38, 0.0  ;;  %v8274_v20 = vld [vmem:[#allocation25_spill] sm:$0xff] }
 0x205   : > { %v8233_v30 = vsel %vm8230_vm8, %v8231_v57, %v8232_v4  ;;  %v7330_v37 = vmul.u32.u64.low 3817748708, %v7198_v46  ;;  %v7331_v24 = vmul.u32.u64.high 3817748708, %v7198_v46, %v7330_v37  ;;  %v3158_v1 = vadd.f32 %v5066_v52, %v7150_v34  ;;  %v8237_v42 = vld [vmem:[#allocation14_spill] sm:$0xff]  ;;  %v8241_v4 = vld [vmem:[#allocation24_spill] sm:$0xff] }
 0x206   : > { %vm7325_vm0 = vcmp.lt.s32.totalorder %v8233_v30, 16  ;;  %vm8236_vm7 = vnez %v8108_v23  ;;  %v3544_v48 = vmul.u32 18, %v3543_v19  ;;  %v7344_v45 = vadd.s32 256, %v6433_v11  ;;  %v8243_v52 = vld [vmem:[#allocation22_spill] sm:$0xff]  ;;  %v8244_v23 = vld [vmem:[#allocation16_spill] sm:$0xff] }
 0x207   : > { %v8238_v2 = vsel %vm8236_vm7, %v6817_v22, %v8237_v42  ;;  %v3952_v57 = vsel %vm7212_vm15, %v3195_v60, 0.0  ;;  %v3196_v38 = vmax.f32 %v3160_v40, 0.0  ;;  %vm8242_vm14 = vnez %v8241_v4  ;;  %v5031_v40 = vpop.f32.mrb[8].mxu0  ;;  %v8354_v32 = vld [vmem:[#allocation6_spill] sm:$0xff] }
 0x208   : > { %vm7339_vm3 = vcmp.lt.s32.totalorder %v8238_v2, 16  ;;  %v8245_v30 = vsel %vm8242_vm14, %v8243_v52, %v8244_v23  ;;  %v7358_v37 = vmul.u32.u64.low 3817748708, %v7281_v58  ;;  %v7359_v19 = vmul.u32.u64.high 3817748708, %v7281_v58, %v7358_v37  ;;  %v8248_v23 = vld [vmem:[#allocation17_spill] sm:$0xff]  ;;  %v2999_v58 = vpop.f32.mrb[9].mxu0 }
 0x209   : > { %vm7353_vm8 = vcmp.lt.s32.totalorder %v8245_v30, 16  ;;  %v4514_v42 = vpack.c.bf16 %v3952_v57, %v3952_v57  ;;  %v3950_v59 = vsel %vm7229_vm2, %v3193_v44, 0.0  ;;  %v3194_v60 = vmax.f32 %v3158_v1, 0.0  ;;  %v8250_v1 = vld [vmem:[#allocation19_spill] sm:$0xff] }
 0x20a   : > { %v7365_v2 = vsub.s32 %v7021_v15, %v3566_v6  ;;  %v4512_v4 = vpack.c.bf16 %v3950_v59, %v3950_v59  ;;  %v3953_v52 = vsel %vm7244_vm11, %v3196_v38, 0.0  ;;  %v5067_v30 = vadd.f32 %v5031_v40, %v8248_v23  ;;  %v5032_v6 = vpop.f32.mrb[10].mxu0  ;;  %v8252_v59 = vld [vmem:[#allocation20_spill] sm:$0xff] }
 0x20b   : > { %v3598_v37 = vshrl.u32 %v7256_v63, 4  ;;  %vm8249_vm15 = vcmask 519168   ;;  %v4515_v18 = vpack.c.bf16 %v3953_v52, %v3953_v52  ;;  %v3951_v44 = vsel %vm7270_vm13, %v3194_v60, 0.0  ;;  %v3002_v63 = vpop.f32.mrb[11].mxu0  ;;  %v8254_v60 = vld [vmem:[#allocation21_spill] sm:$0xff] }
 0x20c   : > { %4133 = vst.msk [vmem:[%s7261_s27 + $0x18] sm:$0xf] %vm8249_vm15, %v4514_v42  ;;  %v5068_v15 = vadd.f32 %v2999_v58, %v8250_v1  ;;  %v3576_v57 = vshrl.u32 %v7276_v29, 4  ;;  %vm8251_vm2 = vmmov %vm8249_vm15  ;;  %v4513_v10 = vpack.c.bf16 %v3951_v44, %v3951_v44  ;;  %v3163_v38 = vadd.f32 %v5067_v30, %v7150_v34  ;;  %v8256_v29 = vld [vmem:[#allocation18_spill] sm:$0xff] }
 0x20d   : > { %4131 = vst.msk [vmem:[%s7261_s27 + $0x10] sm:$0xf] %vm8251_vm2, %v4512_v4  ;;  %v5069_v40 = vadd.f32 %v5032_v6, %v8252_v59  ;;  %v7382_v42 = vsub.s32 %v7127_v17, %v3544_v48  ;;  %vm8253_vm11 = vmmov %vm8251_vm2  ;;  %v5070_v58 = vadd.f32 %v3002_v63, %v8254_v60  ;;  %vm8255_vm13 = vnez %v8116_v21  ;;  %v8261_v30 = vld [vmem:[#allocation30_spill] sm:$0xff]  ;;  %v8263_v21 = vld [vmem:[#allocation29_spill] sm:$0xff] }
 0x20e   : > { %4134 = vst.msk [vmem:[%s7261_s27 + $0x1c] sm:$0xf] %vm8253_vm11, %v4515_v18  ;;  %v3161_v36 = vadd.f32 %v5068_v15, %v7150_v34  ;;  %v8257_v4 = vsel %vm8255_vm13, %v6863_v33, %v8256_v29  ;;  %vm3685_vm14 = vcmp.ne.s32.totalorder %v7365_v2, 0  ;;  %v7399_v17 = vadd.s32 280, %v6433_v11  ;;  %vm8260_vm15 = vmmov %vm8251_vm2  ;;  %v8264_v18 = vld [vmem:[#allocation23_spill] sm:$0xff] }
 0x20f   : > { %vm7393_vm7 = vcmp.lt.s32.totalorder %v8257_v4, 16  ;;  %4132 = vst.msk [vmem:[%s7261_s27 + $0x14] sm:$0xf] %vm8260_vm15, %v4513_v10  ;;  %v3199_v48 = vmax.f32 %v3163_v38, 0.0  ;;  %v3164_v23 = vadd.f32 %v5069_v40, %v7150_v34  ;;  %vm8262_vm2 = vnez %v8261_v30 }
 0x210   : > { %v8265_v44 = vsel %vm8262_vm2, %v8263_v21, %v8264_v18  ;;  %vm3721_vm13 = vcmp.lt.s32.totalorder %v7365_v2, 0  ;;  %v7415_v1 = vadd.s32 18, %v7365_v2  ;;  %v3197_v15 = vmax.f32 %v3161_v36, 0.0 }
 0x211   : > { %vm7409_vm11 = vcmp.lt.s32.totalorder %v8265_v44, 16  ;;  %v3162_v6 = vadd.f32 %v5070_v58, %v7150_v34  ;;  %v8268_v10 = vsel %vm6949_vm10, %v6922_v16, %v6881_v47  ;;  %v3599_v59 = vmul.u32 18, %v3598_v37  ;;  %v5035_v37 = vpop.f32.mrb[12].mxu0  ;;  %vm7450_vm12 = vmand %vm3721_vm13, %vm3685_vm14 }
 0x212   : > { %vm7423_vm15 = vcmp.lt.s32.totalorder %v8268_v10, 16  ;;  %v3609_v40 = vshrl.u32 %v7315_v31, 4  ;;  %v3956_v63 = vsel %vm7309_vm9, %v3199_v48, 0.0  ;;  %v3200_v60 = vmax.f32 %v3164_v23, 0.0  ;;  %v3015_v29 = vpop.f32.mrb[13].mxu0  ;;  %v8278_v48 = vld [vmem:[#allocation26_spill] sm:$0xff] }
 0x213   : > { %vm7435_vm2 = vcmp.lt.s32.totalorder %v8271_v41, 16  ;;  %vm3683_vm10 = vcmp.ne.s32.totalorder %v7382_v42, 0  ;;  %v3577_v47 = vmul.u32 18, %v3576_v57  ;;  %v4518_v16 = vpack.c.bf16 %v3956_v63, %v3956_v63  ;;  %v5036_v30 = vpop.f32.mrb[14].mxu0 }
 0x214   : > { %v3954_v31 = vsel %vm7325_vm0, %v3197_v15, 0.0  ;;  %v3198_v25 = vmax.f32 %v3162_v6, 0.0  ;;  %vm3719_vm9 = vcmp.lt.s32.totalorder %v7382_v42, 0  ;;  %v3957_v56 = vsel %vm7339_vm3, %v3200_v60, 0.0  ;;  %v8280_v15 = vld [vmem:[#allocation27_spill] sm:$0xff]  ;;  %v3018_v6 = vpop.f32.mrb[15].mxu0 }
 0x215   : > { %v4516_v49 = vpack.c.bf16 %v3954_v31, %v3954_v31  ;;  %v5071_v58 = vadd.f32 %v5035_v37, %v8274_v20  ;;  %v3587_v57 = vshrl.u32 %v7331_v24, 4  ;;  %vm8277_vm0 = vcmask 519168   ;;  %v8284_v60 = vld [vmem:[#allocation28_spill] sm:$0xff] }
 0x216   : > { %4137 = vst.msk [vmem:[%s7261_s27 + $0x28] sm:$0xf] %vm8277_vm0, %v4518_v16  ;;  %v4519_v4 = vpack.c.bf16 %v3957_v56, %v3957_v56  ;;  %v3955_v35 = vsel %vm7353_vm8, %v3198_v25, 0.0  ;;  %v5072_v23 = vadd.f32 %v3015_v29, %v8278_v48  ;;  %v7461_v21 = vadd.s32 18, %v7382_v42  ;;  %vm8279_vm3 = vmmov %vm8277_vm0  ;;  %v5039_v48 = vpop.f32.mrb[16].mxu0 }
 0x217   : > { %4135 = vst.msk [vmem:[%s7261_s27 + $0x20] sm:$0xf] %vm8279_vm3, %v4516_v49  ;;  %v4517_v18 = vpack.c.bf16 %v3955_v35, %v3955_v35  ;;  %v3167_v44 = vadd.f32 %v5071_v58, %v7150_v34  ;;  %v5073_v24 = vadd.f32 %v5036_v30, %v8280_v15  ;;  %vm7471_vm8 = vmand %vm3719_vm9, %vm3683_vm10  ;;  %v7476_v10 = vadd.s32 264, %v6433_v11  ;;  %v7501_v49 = vpop.f32.mrb[20].mxu1  ;;  %v8300_v30 = vld [vmem:[#allocation32_spill] sm:$0xff] }
 0x218   : > { %vm8283_vm14 = vmmov %vm8277_vm0  ;;  %v3165_v63 = vadd.f32 %v5072_v23, %v7150_v34  ;;  %v5074_v41 = vadd.f32 %v3018_v6, %v8284_v60  ;;  %v8285_v16 = vsel %vm6982_vm4, %v6992_v53, %v6908_v28  ;;  %v3829_v11 = vsel %vm7450_vm12, %v7415_v1, %v7365_v2  ;;  %v7516_v58 = vpop.f32.mrb[21].mxu1 }
 0x219   : > { %4138 = vst.msk [vmem:[%s7261_s27 + $0x2c] sm:$0xf] %vm8283_vm14, %v4519_v4  ;;  %vm7487_vm13 = vcmp.lt.s32.totalorder %v8285_v16, 16  ;;  %v7496_v25 = vsub.s32 %v7164_v27, %v3599_v59  ;;  %vm8288_vm10 = vmmov %vm8277_vm0  ;;  %v3203_v37 = vmax.f32 %v3167_v44, 0.0  ;;  %v3168_v62 = vadd.f32 %v5073_v24, %v7150_v34  ;;  %v7533_v29 = vpop.f32.mrb[22].mxu1  ;;  %v3031_v44 = vpop.f32.mrb[17].mxu0 }
 0x21a   : > { %4136 = vst.msk [vmem:[%s7261_s27 + $0x24] sm:$0xf] %vm8288_vm10, %v4517_v18  ;;  %v8289_v28 = vsel %vm6998_vm1, %v7003_v3, %v6919_v5  ;;  %v7513_v56 = vsub.s32 %v7179_v0, %v3577_v47  ;;  %v3610_v27 = vmul.u32 18, %v3609_v40  ;;  %v3201_v59 = vmax.f32 %v3165_v63, 0.0  ;;  %vm8301_vm14 = vmmov %vm8288_vm10  ;;  %v8302_v24 = vld [vmem:[#allocation34_spill] sm:$0xff]  ;;  %v5040_v63 = vpop.f32.mrb[18].mxu0 }
 0x21b   : > { %vm7508_vm4 = vcmp.lt.s32.totalorder %v8289_v28, 16  ;;  %v3166_v20 = vadd.f32 %v5074_v41, %v7150_v34  ;;  %vm8292_vm9 = vnez %v8150_v12  ;;  %v3827_v3 = vsel %vm7471_vm8, %v7461_v21, %v7382_v42  ;;  %v8303_v41 = vld [vmem:[#allocation36_spill] sm:$0xff]  ;;  %v8305_v28 = vld [vmem:[#allocation37_spill] sm:$0xff] }
 0x21c   : > { %v8293_v43 = vsel %vm8292_vm9, %v7016_v7, %v6925_v13  ;;  %v3588_v0 = vmul.u32 18, %v3587_v57  ;;  %v3960_v40 = vsel %vm7393_vm7, %v3203_v37, 0.0  ;;  %v3204_v47 = vmax.f32 %v3168_v62, 0.0  ;;  %v3034_v37 = vpop.f32.mrb[19].mxu0 }
 0x21d   : > { %vm7523_vm0 = vcmp.lt.s32.totalorder %v8293_v43, 16  ;;  %vm8296_vm1 = vnez %v8153_v54  ;;  %v7545_v7 = vmul.u32.u64.low 3817748708, %v7344_v45  ;;  %v7546_v4 = vmul.u32.u64.high 3817748708, %v7344_v45, %v7545_v7  ;;  %v7551_v54 = vpop.f32.mrb[23].mxu1  ;;  %v8308_v43 = vld [vmem:[#allocation39_spill] sm:$0xff] }
 0x21e   : > { %v8297_v13 = vsel %vm8296_vm1, %v7030_v39, %v6931_v51  ;;  %v4522_v52 = vpack.c.bf16 %v3960_v40, %v3960_v40  ;;  %v3958_v57 = vsel %vm7409_vm11, %v3201_v59, 0.0  ;;  %v3202_v35 = vmax.f32 %v3166_v20, 0.0  ;;  %v8306_v20 = vld [vmem:[#allocation38_spill] sm:$0xff]  ;;  %v8309_v40 = vld [vmem:[#allocation31_spill] sm:$0xff] }
 0x21f   : > { %vm7540_vm3 = vcmp.lt.s32.totalorder %v8297_v13, 16  ;;  %v3642_v51 = vshrl.u32 %v7359_v19, 4  ;;  %v4520_v39 = vpack.c.bf16 %v3958_v57, %v3958_v57  ;;  %v3961_v23 = vsel %vm7423_vm15, %v3204_v47, 0.0  ;;  %vm8304_vm15 = vmmov %vm8288_vm10  ;;  %v7589_v57 = vpop.f32.mrb[24].mxu1 }
 0x220   : > { %v5075_v18 = vadd.f32 %v5039_v48, %v8300_v30  ;;  %vm3688_vm7 = vcmp.ne.s32.totalorder %v7496_v25, 0  ;;  %4141 = vst.msk [vmem:[%s7261_s27 + $0x38] sm:$0xf] %vm8301_vm14, %v4522_v52  ;;  %v4523_v33 = vpack.c.bf16 %v3961_v23, %v3961_v23  ;;  %v3959_v15 = vsel %vm7435_vm2, %v3202_v35, 0.0  ;;  %v8313_v35 = vld [vmem:[#allocation41_spill] sm:$0xff]  ;;  %v8315_v48 = vld [vmem:[#allocation42_spill] sm:$0xff] }
 0x221   : > { %v5076_v6 = vadd.f32 %v3031_v44, %v8302_v24  ;;  %vm3724_vm11 = vcmp.lt.s32.totalorder %v7496_v25, 0  ;;  %4139 = vst.msk [vmem:[%s7261_s27 + $0x30] sm:$0xf] %vm8288_vm10, %v4520_v39  ;;  %v4521_v38 = vpack.c.bf16 %v3959_v15, %v3959_v15  ;;  %v5077_v16 = vadd.f32 %v5040_v63, %v8303_v41  ;;  %v8316_v39 = vld [vmem:[#allocation33_spill] sm:$0xff]  ;;  %v7607_v24 = vpop.f32.mrb[25].mxu1  ;;  %v8322_v63 = vld [vmem:[#allocation43_spill] sm:$0xff] }
 0x222   : > { %v3171_v60 = vadd.f32 %v5075_v18, %v7150_v34  ;;  %v7569_v62 = vadd.s32 18, %v7496_v25  ;;  %4142 = vst.msk [vmem:[%s7261_s27 + $0x3c] sm:$0xf] %vm8304_vm15, %v4523_v33  ;;  %v5078_v59 = vadd.f32 %v3034_v37, %v8305_v28  ;;  %vm8307_vm2 = vnez %v8306_v20 }
 0x223   : > { %v3169_v36 = vadd.f32 %v5076_v6, %v7150_v34  ;;  %v8310_v47 = vsel %vm8307_vm2, %v8308_v43, %v8309_v40  ;;  %vm3686_vm1 = vcmp.ne.s32.totalorder %v7513_v56, 0  ;;  %4140 = vst.msk [vmem:[%s7261_s27 + $0x34] sm:$0xf] %vm8288_vm10, %v4521_v38  ;;  %v3172_v52 = vadd.f32 %v5077_v16, %v7150_v34  ;;  %v8320_v6 = vld [vmem:[#allocation44_spill] sm:$0xff]  ;;  %v8323_v38 = vld [vmem:[#allocation35_spill] sm:$0xff] }
 0x224   : > { %vm7580_vm9 = vcmp.lt.s32.totalorder %v8310_v47, 16  ;;  %v3207_v7 = vmax.f32 %v3171_v60, 0.0  ;;  %vm8314_vm15 = vnez %v8313_v35  ;;  %v7601_v18 = vadd.s32 18, %v7513_v56 }
 0x225   : > { %v8317_v23 = vsel %vm8314_vm15, %v8315_v48, %v8316_v39  ;;  %v7604_v44 = vsub.s32 %v7182_v61, %v3610_v27  ;;  %v3205_v33 = vmax.f32 %v3169_v36, 0.0  ;;  %v3170_v15 = vadd.f32 %v5078_v59, %v7150_v34  ;;  %v7624_v36 = vpop.f32.mrb[26].mxu1 }
 0x226   : > { %vm7596_vm2 = vcmp.lt.s32.totalorder %v8317_v23, 16  ;;  %vm8321_vm10 = vnez %v8320_v6  ;;  %v7619_v16 = vmul.u32.u64.low 3817748708, %v7399_v17  ;;  %v7620_v37 = vmul.u32.u64.high 3817748708, %v7399_v17, %v7619_v16 }
 0x227   : > { %v8324_v60 = vsel %vm8321_vm10, %v8322_v63, %v8323_v38  ;;  %v3964_v61 = vsel %vm7487_vm13, %v3207_v7, 0.0  ;;  %v3208_v27 = vmax.f32 %v3172_v52, 0.0  ;;  %vm8327_vm14 = vnez %v8186_v26  ;;  %v5043_v7 = vpop.f32.mrb[20].mxu0  ;;  %v7641_v52 = vpop.f32.mrb[27].mxu1  ;;  %vm7653_vm13 = vmand %vm3724_vm11, %vm3688_vm7  ;;  %v8339_v38 = vld [vmem:[#allocation40_spill] sm:$0xff] }
 0x228   : > { %vm7614_vm15 = vcmp.lt.s32.totalorder %v8324_v60, 16  ;;  %v8328_v28 = vsel %vm8327_vm14, %v7161_v8, %v7035_v9  ;;  %v7636_v20 = vmul.u32.u64.low 3817748708, %v7476_v10  ;;  %v7637_v43 = vmul.u32.u64.high 3817748708, %v7476_v10, %v7636_v20  ;;  %v3047_v48 = vpop.f32.mrb[21].mxu0  ;;  %v7699_v50 = vpop.f32.mrb[28].mxu1 }
 0x229   : > { %vm7631_vm10 = vcmp.lt.s32.totalorder %v8328_v28, 16  ;;  %v4526_v40 = vpack.c.bf16 %v3964_v61, %v3964_v61  ;;  %v3962_v31 = vsel %vm7508_vm4, %v3205_v33, 0.0  ;;  %v3206_v47 = vmax.f32 %v3170_v15, 0.0 }
 0x22a   : > { %v7644_v26 = vsub.s32 %v7198_v46, %v3588_v0  ;;  %v4524_v9 = vpack.c.bf16 %v3962_v31, %v3962_v31  ;;  %v3965_v8 = vsel %vm7523_vm0, %v3208_v27, 0.0  ;;  %v5079_v35 = vadd.f32 %v5043_v7, %v7501_v49  ;;  %v5044_v0 = vpop.f32.mrb[22].mxu0 }
 0x22b   : > { %vm8333_vm14 = vcmask 519168   ;;  %v4527_v46 = vpack.c.bf16 %v3965_v8, %v3965_v8  ;;  %v3963_v5 = vsel %vm7540_vm3, %v3206_v47, 0.0  ;;  %v5080_v49 = vadd.f32 %v3047_v48, %v7516_v58  ;;  %v3050_v58 = vpop.f32.mrb[23].mxu0 }
 0x22c   : > { %4145 = vst.msk [vmem:[%s7261_s27 + $0x48] sm:$0xf] %vm8333_vm14, %v4526_v40  ;;  %vm8334_vm0 = vcmp.lt.s32.totalorder %v7513_v56, 0  ;;  %vm3725_vm11 = vcmp.lt.s32.totalorder %v7604_v44, 0  ;;  %vm8337_vm4 = vmmov %vm8333_vm14  ;;  %v4525_v23 = vpack.c.bf16 %v3963_v5, %v3963_v5  ;;  %v3175_v12 = vadd.f32 %v5079_v35, %v7150_v34  ;;  %v7724_v40 = vpop.f32.mrb[29].mxu1  ;;  %v5047_v35 = vpop.f32.mrb[24].mxu0 }
 0x22d   : > { %vm7667_vm7 = vmand %vm8334_vm0, %vm3686_vm1  ;;  %4143 = vst.msk [vmem:[%s7261_s27 + $0x40] sm:$0xf] %vm8337_vm4, %v4524_v9  ;;  %v5081_v33 = vadd.f32 %v5044_v0, %v7533_v29  ;;  %v3643_v15 = vmul.u32 18, %v3642_v51  ;;  %v3173_v6 = vadd.f32 %v5080_v49, %v7150_v34  ;;  %v5082_v63 = vadd.f32 %v3050_v58, %v7551_v54  ;;  %v7741_v7 = vpop.f32.mrb[30].mxu1 }
 0x22e   : > { %vm8338_vm3 = vmmov %vm8337_vm4  ;;  %v8340_v60 = vsel %vm7189_vm6, %v7176_v14, %v8339_v38  ;;  %v3832_v19 = vsel %vm7653_vm13, %v7569_v62, %v7496_v25  ;;  %v3797_v29 = vadd.s32 18, %v7604_v44  ;;  %v3211_v51 = vmax.f32 %v3175_v12, 0.0  ;;  %v8345_v14 = vld [vmem:[#allocation45_spill] sm:$0xff]  ;;  %v7749_v48 = vpop.f32.mrb[31].mxu1 }
 0x22f   : > { %4146 = vst.msk [vmem:[%s7261_s27 + $0x4c] sm:$0xf] %vm8338_vm3, %v4527_v46  ;;  %vm7687_vm1 = vcmp.lt.s32.totalorder %v8340_v60, 16  ;;  %vm8343_vm4 = vmmov %vm8338_vm3  ;;  %v3176_v54 = vadd.f32 %v5081_v33, %v7150_v34  ;;  %v8346_v27 = vsel %vm7250_vm5, %v7221_v55, %v8345_v14  ;;  %v3830_v25 = vsel %vm7667_vm7, %v7601_v18, %v7513_v56 }
 0x230   : > { %4144 = vst.msk [vmem:[%s7261_s27 + $0x44] sm:$0xf] %vm8343_vm4, %v4525_v23  ;;  %vm7706_vm6 = vcmp.lt.s32.totalorder %v8346_v27, 16  ;;  %vm8349_vm13 = vcmp.ne.s32.totalorder %v7604_v44, 0  ;;  %vm3687_vm0 = vcmp.ne.s32.totalorder %v7644_v26, 0  ;;  %v3209_v55 = vmax.f32 %v3173_v6, 0.0  ;;  %vm8355_vm12 = vmmov %vm8338_vm3 }
 0x231   : > { %vm7718_vm14 = vmand %vm3725_vm11, %vm8349_vm13  ;;  %v3174_v20 = vadd.f32 %v5082_v63, %v7150_v34  ;;  %vm7731_vm5 = vcmp.lt.s32.totalorder %v3829_v11, 16  ;;  %vm3723_vm7 = vcmp.lt.s32.totalorder %v7644_v26, 0  ;;  %v7737_v18 = vadd.s32 18, %v7644_v26  ;;  %v7796_v63 = vpop.f32.mrb[32].mxu1 }
 0x232   : > { %v3968_v31 = vsel %vm7580_vm9, %v3211_v51, 0.0  ;;  %v3212_v47 = vmax.f32 %v3176_v54, 0.0  ;;  %v7744_v9 = vsub.s32 %v8354_v32, %v3643_v15  ;;  %v3620_v2 = vshrl.u32 %v7546_v4, 4  ;;  %v3063_v4 = vpop.f32.mrb[25].mxu0  ;;  %vm7767_vm9 = vmand %vm3723_vm7, %vm3687_vm0  ;;  %v7807_v38 = vpop.f32.mrb[33].mxu1 }
 0x233   : > { %v4530_v1 = vpack.c.bf16 %v3968_v31, %v3968_v31  ;;  %v3966_v11 = vsel %vm7596_vm2, %v3209_v55, 0.0  ;;  %v3210_v8 = vmax.f32 %v3174_v20, 0.0  ;;  %v3833_v13 = vsel %vm7718_vm14, %v3797_v29, %v7604_v44  ;;  %v5048_v44 = vpop.f32.mrb[26].mxu0  ;;  %vm8358_vm2 = vmmov %vm8338_vm3  ;;  %v7816_v54 = vpop.f32.mrb[34].mxu1 }
 0x234   : > { %v4528_v53 = vpack.c.bf16 %v3966_v11, %v3966_v11  ;;  %v3969_v46 = vsel %vm7614_vm15, %v3212_v47, 0.0  ;;  %v5083_v5 = vadd.f32 %v5047_v35, %v7589_v57  ;;  %v3653_v30 = vshrl.u32 %v7620_v37, 4  ;;  %v3066_v12 = vpop.f32.mrb[27].mxu0  ;;  %vm8359_vm15 = vmmov %vm8358_vm2  ;;  %v7824_v62 = vpop.f32.mrb[35].mxu1 }
 0x235   : > { %4149 = vst.msk [vmem:[%s7261_s27 + $0x58] sm:$0xf] %vm8355_vm12, %v4530_v1  ;;  %v4531_v49 = vpack.c.bf16 %v3969_v46, %v3969_v46  ;;  %v3967_v0 = vsel %vm7631_vm10, %v3210_v8, 0.0  ;;  %v5084_v39 = vadd.f32 %v3063_v4, %v7607_v24  ;;  %v3631_v41 = vshrl.u32 %v7637_v43, 4  ;;  %vm8364_vm3 = vmmov %vm8358_vm2 }
 0x236   : > { %4147 = vst.msk [vmem:[%s7261_s27 + $0x50] sm:$0xf] %vm8358_vm2, %v4528_v53  ;;  %v4529_v37 = vpack.c.bf16 %v3967_v0, %v3967_v0  ;;  %v3179_v59 = vadd.f32 %v5083_v5, %v7150_v34  ;;  %v5085_v23 = vadd.f32 %v5048_v44, %v7624_v36  ;;  %v3621_v24 = vmul.u32 18, %v3620_v2 }
 0x237   : > { %4150 = vst.msk [vmem:[%s7261_s27 + $0x5c] sm:$0xf] %vm8359_vm15, %v4531_v49  ;;  %v3177_v33 = vadd.f32 %v5084_v39, %v7150_v34  ;;  %v5086_v58 = vadd.f32 %v3066_v12, %v7641_v52  ;;  %vm7785_vm10 = vcmp.lt.s32.totalorder %v3827_v3, 16  ;;  %vm7789_vm11 = vcmp.lt.s32.totalorder %v3832_v19, 16 }
 0x238   : > { %4148 = vst.msk [vmem:[%s7261_s27 + $0x54] sm:$0xf] %vm8364_vm3, %v4529_v37  ;;  %v3215_v36 = vmax.f32 %v3179_v59, 0.0  ;;  %v3180_v6 = vadd.f32 %v5085_v23, %v7150_v34  ;;  %vm7798_vm4 = vcmp.lt.s32.totalorder %v3830_v25, 16  ;;  %v3831_v42 = vsel %vm7767_vm9, %v7737_v18, %v7644_v26  ;;  %v5051_v25 = vpop.f32.mrb[28].mxu0 }
 0x239   : > { %v3654_v21 = vmul.u32 18, %v3653_v30  ;;  %v3213_v3 = vmax.f32 %v3177_v33, 0.0  ;;  %v3178_v52 = vadd.f32 %v5086_v58, %v7150_v34  ;;  %vm7809_vm8 = vcmp.lt.s32.totalorder %v3833_v13, 16  ;;  %v3079_v18 = vpop.f32.mrb[29].mxu0 }
 0x23a   : > { %vm3692_vm13 = vcmp.ne.s32.totalorder %v7744_v9, 0  ;;  %v3632_v19 = vmul.u32 18, %v3631_v41  ;;  %v3972_v29 = vsel %vm7687_vm1, %v3215_v36, 0.0  ;;  %v3216_v51 = vmax.f32 %v3180_v6, 0.0  ;;  %vm8369_vm1 = vmmov %vm8358_vm2  ;;  %v5052_v2 = vpop.f32.mrb[30].mxu0 }
 0x23b   : > { %vm3728_vm14 = vcmp.lt.s32.totalorder %v7744_v9, 0  ;;  %v7820_v26 = vsub.s32 %v7344_v45, %v3621_v24  ;;  %v4534_v61 = vpack.c.bf16 %v3972_v29, %v3972_v29  ;;  %v3970_v14 = vsel %vm7706_vm6, %v3213_v3, 0.0  ;;  %vm8370_vm6 = vmmov %vm8369_vm1  ;;  %v3082_v11 = vpop.f32.mrb[31].mxu0 }
 0x23c   : > { %v3214_v27 = vmax.f32 %v3178_v52, 0.0  ;;  %v7827_v16 = vadd.s32 18, %v7744_v9  ;;  %v4532_v55 = vpack.c.bf16 %v3970_v14, %v3970_v14  ;;  %v3973_v20 = vsel %vm7731_vm5, %v3216_v51, 0.0  ;;  %vm8371_vm5 = vmmov %vm8369_vm1  ;;  %v5055_v57 = vpop.f32.mrb[32].mxu0 }
 0x23d   : > { %v5087_v45 = vadd.f32 %v5051_v25, %v7699_v50  ;;  %v7833_v31 = vsub.s32 %v7399_v17, %v3654_v21  ;;  %4153 = vst.msk [vmem:[%s7261_s27 + $0x68] sm:$0xf] %vm8369_vm1, %v4534_v61  ;;  %v4535_v28 = vpack.c.bf16 %v3973_v20, %v3973_v20  ;;  %v5088_v32 = vadd.f32 %v3079_v18, %v7724_v40  ;;  %vm8372_vm12 = vmmov %vm8369_vm1  ;;  %v3095_v33 = vpop.f32.mrb[33].mxu0 }
 0x23e   : > { %v3971_v47 = vsel %vm7785_vm10, %v3214_v27, 0.0  ;;  %v7841_v56 = vsub.s32 %v7476_v10, %v3632_v19  ;;  %4151 = vst.msk [vmem:[%s7261_s27 + $0x60] sm:$0xf] %vm8370_vm6, %v4532_v55  ;;  %v5089_v17 = vadd.f32 %v5052_v2, %v7741_v7  ;;  %vm3690_vm0 = vcmp.ne.s32.totalorder %v7820_v26, 0  ;;  %vm7864_vm15 = vmand %vm3728_vm14, %vm3692_vm13  ;;  %v5056_v6 = vpop.f32.mrb[34].mxu0 }
 0x23f   : > { %v4533_v50 = vpack.c.bf16 %v3971_v47, %v3971_v47  ;;  %v3183_v1 = vadd.f32 %v5087_v45, %v7150_v34  ;;  %4154 = vst.msk [vmem:[%s7261_s27 + $0x6c] sm:$0xf] %vm8371_vm5, %v4535_v28  ;;  %v3181_v8 = vadd.f32 %v5088_v32, %v7150_v34  ;;  %v5090_v40 = vadd.f32 %v3082_v11, %v7749_v48  ;;  %vm8383_vm14 = vmmov %vm8371_vm5  ;;  %v3098_v3 = vpop.f32.mrb[35].mxu0 }
 0x240   : > { %vm3726_vm7 = vcmp.lt.s32.totalorder %v7820_v26, 0  ;;  %v3798_v10 = vadd.s32 18, %v7820_v26  ;;  %v3184_v13 = vadd.f32 %v5089_v17, %v7150_v34  ;;  %vm3693_vm9 = vcmp.ne.s32.totalorder %v7833_v31, 0  ;;  %vm8385_vm6 = vmmov %vm8371_vm5 }
 0x241   : > { %4152 = vst.msk [vmem:[%s7261_s27 + $0x64] sm:$0xf] %vm8372_vm12, %v4533_v50  ;;  %v3219_v35 = vmax.f32 %v3183_v1, 0.0  ;;  %vm3729_vm2 = vcmp.lt.s32.totalorder %v7833_v31, 0  ;;  %v3217_v7 = vmax.f32 %v3181_v8, 0.0  ;;  %v3182_v53 = vadd.f32 %v5090_v40, %v7150_v34  ;;  %vm7880_vm13 = vmand %vm3726_vm7, %vm3690_vm0 }
 0x242   : > { %vm3691_vm10 = vcmp.ne.s32.totalorder %v7841_v56, 0  ;;  %vm3727_vm3 = vcmp.lt.s32.totalorder %v7841_v56, 0  ;;  %v3220_v5 = vmax.f32 %v3184_v13, 0.0  ;;  %vm7872_vm1 = vcmp.lt.s32.totalorder %v3831_v42, 16 }
 0x243   : > { %v3976_v46 = vsel %vm7789_vm11, %v3219_v35, 0.0  ;;  %v3801_v49 = vadd.s32 18, %v7833_v31  ;;  %v3974_v39 = vsel %vm7798_vm4, %v3217_v7, 0.0  ;;  %v3218_v44 = vmax.f32 %v3182_v53, 0.0  ;;  %vm7891_vm11 = vmand %vm3729_vm2, %vm3693_vm9 }
 0x244   : > { %v4538_v0 = vpack.c.bf16 %v3976_v46, %v3976_v46  ;;  %v3799_v37 = vadd.s32 18, %v7841_v56  ;;  %v4536_v59 = vpack.c.bf16 %v3974_v39, %v3974_v39  ;;  %v3977_v23 = vsel %vm7809_vm8, %v3220_v5, 0.0  ;;  %vm7907_vm4 = vmand %vm3727_vm3, %vm3691_vm10 }
 0x245   : > { %v5091_v12 = vadd.f32 %v5055_v57, %v7796_v63  ;;  %v3836_v24 = vsel %vm7864_vm15, %v7827_v16, %v7744_v9  ;;  %v4539_v43 = vpack.c.bf16 %v3977_v23, %v3977_v23  ;;  %v3975_v15 = vsel %vm7872_vm1, %v3218_v44, 0.0  ;;  %vm8384_vm8 = vmmov %vm8371_vm5 }
 0x246   : > { %4157 = vst.msk [vmem:[%s7261_s27 + $0x78] sm:$0xf] %vm8383_vm14, %v4538_v0  ;;  %v5092_v36 = vadd.f32 %v3095_v33, %v7807_v38  ;;  %v3834_v9 = vsel %vm7880_vm13, %v3798_v10, %v7820_v26  ;;  %v4537_v63 = vpack.c.bf16 %v3975_v15, %v3975_v15  ;;  %v5093_v42 = vadd.f32 %v5056_v6, %v7816_v54  ;;  %vm8386_vm2 = vmmov %vm8371_vm5 }
 0x247   : > { %4155 = vst.msk [vmem:[%s7261_s27 + $0x70] sm:$0xf] %vm8384_vm8, %v4536_v59  ;;  %v3187_v22 = vadd.f32 %v5091_v12, %v7150_v34  ;;  %v3837_v21 = vsel %vm7891_vm11, %v3801_v49, %v7833_v31  ;;  %vm3872_vm0 = vcmp.lt.s32.totalorder %v3836_v24, 16  ;;  %v5094_v38 = vadd.f32 %v3098_v3, %v7824_v62  ;;  %vm8387_vm15 = vmmov %vm8386_vm2 }
 0x248   : > { %4158 = vst.msk [vmem:[%s7261_s27 + $0x7c] sm:$0xf] %vm8385_vm6, %v4539_v43  ;;  %v3185_v52 = vadd.f32 %v5092_v36, %v7150_v34  ;;  %v3835_v60 = vsel %vm7907_vm4, %v3799_v37, %v7841_v56  ;;  %vm3870_vm7 = vcmp.lt.s32.totalorder %v3834_v9, 16  ;;  %v3188_v29 = vadd.f32 %v5093_v42, %v7150_v34  ;;  %vm8388_vm10 = vmmov %vm8386_vm2 }
 0x249   : > { %4156 = vst.msk [vmem:[%s7261_s27 + $0x74] sm:$0xf] %vm8371_vm5, %v4537_v63  ;;  %v3223_v19 = vmax.f32 %v3187_v22, 0.0  ;;  %vm3873_vm12 = vcmp.lt.s32.totalorder %v3837_v21, 16  ;;  %v3186_v54 = vadd.f32 %v5094_v38, %v7150_v34  ;;  %vm3871_vm9 = vcmp.lt.s32.totalorder %v3835_v60, 16  ;;  %vm8389_vm3 = vmmov %vm8386_vm2 }
 0x24a   : > { %v3221_v51 = vmax.f32 %v3185_v52, 0.0  ;;  %v3224_v61 = vmax.f32 %v3188_v29, 0.0 }
 0x24b   : > { %v3980_v26 = vsel %vm3872_vm0, %v3223_v19, 0.0  ;;  %v3222_v25 = vmax.f32 %v3186_v54, 0.0 }
 0x24c   : > { %v4542_v14 = vpack.c.bf16 %v3980_v26, %v3980_v26  ;;  %v3978_v27 = vsel %vm3870_vm7, %v3221_v51, 0.0  ;;  %v3981_v16 = vsel %vm3873_vm12, %v3224_v61, 0.0 }
 0x24d   : > { %v4540_v62 = vpack.c.bf16 %v3978_v27, %v3978_v27  ;;  %v4543_v55 = vpack.c.bf16 %v3981_v16, %v3981_v16  ;;  %v3979_v20 = vsel %vm3871_vm9, %v3222_v25, 0.0 }
 0x24e   : > { %4161 = vst.msk [vmem:[%s7261_s27 + $0x88] sm:$0xf] %vm8386_vm2, %v4542_v14  ;;  %v4541_v45 = vpack.c.bf16 %v3979_v20, %v3979_v20 }
 0x24f   : > { %4159 = vst.msk [vmem:[%s7261_s27 + $0x80] sm:$0xf] %vm8387_vm15, %v4540_v62 }
 0x250   : > { %4162 = vst.msk [vmem:[%s7261_s27 + $0x8c] sm:$0xf] %vm8388_vm10, %v4543_v55 }
 0x251   : > { %4160 = vst.msk [vmem:[%s7261_s27 + $0x84] sm:$0xf] %vm8389_vm3, %v4541_v45 }
 0x252 PF: > { %s14_s17 = sadd.s32 1, %s5491_s17   ;;  %s8390_s15 = smov %s5487_s16 }
 0x253   : > { %p11_p5 = scmp.ge.s32.totalorder %s14_s17, 4   ;;  %s8391_s16 = smov %s8393_s18 }
 0x255   :  { %13 = sbr.rel (!%p11_p5) target bundleno = 2 (0x2), region = 77 }

</bundles_post_ra>
